<compile_context>
chip_gen: v7x
topology: tpu7x:2x2x1
jax: 0.10.0
libtpu: 0.0.40
codegen_flags: <defaults>
</compile_context>

<pallas_src>
import functools

import jax
import jax.numpy as jnp
from jax import lax
from jax.experimental import pallas as pl
from jax.experimental.pallas import tpu as pltpu


def _round_up(a, m):
    return (a + m - 1) // m * m


def _bigru_sum_kernel(x_ref, w_in_ref, w_hh_ref, b_in_ref, b_hhn_ref,
                      out_ref, gi_ref, *, hidden, unroll):
    """Fused bidirectional GRU + sum over time for one batch tile.

    x_ref    : (S, Bt, F)   input tile (x streamed once; no reversed copy)
    w_in_ref : (F, 3G)      input weights, both dirs, layout [r_f r_b|z_f z_b|n_f n_b]
    w_hh_ref : (G, 3G)      block-structured recurrent weights, both dirs
    b_in_ref : (1, 3G)      b_ih (+ folded b_hh for the r/z gates)
    b_hhn_ref: (1, G)       recurrent bias of the n gate (stays under r-multiply)
    out_ref  : (Bt, G)      sum_t [h_fwd | h_bwd] (lane padded to G)
    gi_ref   : (S, Bt, 3G)  VMEM scratch with the hoisted input projection
    """
    S, Bt, F = x_ref.shape
    G3 = w_in_ref.shape[1]
    G = G3 // 3
    H = hidden

    # ---- Hoisted input projection: ONE big MXU matmul for all t, both dirs.
    x2d = x_ref[...].reshape(S * Bt, F)
    gi_all = jnp.dot(x2d, w_in_ref[...], preferred_element_type=jnp.float32)
    gi_all = gi_all + b_in_ref[...].astype(jnp.float32)
    gi_ref[...] = gi_all.reshape(S, Bt, G3).astype(gi_ref.dtype)

    w_hh = w_hh_ref[...]
    b_hhn = b_hhn_ref[...].astype(jnp.float32)

    # Lanes [0:H] of each G-wide gate block are the forward direction, lanes
    # [H:2H] the backward one; the rest is padding that provably stays zero
    # (zero weights/biases + h0 = 0  =>  r = z = 0.5, n = 0, h stays 0).
    lane = lax.broadcasted_iota(jnp.int32, (Bt, G3), 1)
    fwd_lane = (lane % G) < H

    def step(t, carry):
        h, acc = carry                                    # (Bt, G) f32 each
        # fwd gates need x_t, bwd gates need x_{S-1-t}: one vselect per step.
        gi_t = jnp.where(fwd_lane,
                         gi_ref[t].astype(jnp.float32),
                         gi_ref[S - 1 - t].astype(jnp.float32))
        gh = jnp.dot(h.astype(w_hh.dtype), w_hh,
                     preferred_element_type=jnp.float32)
        r = jax.nn.sigmoid(gi_t[:, :G] + gh[:, :G])
        z = jax.nn.sigmoid(gi_t[:, G:2 * G] + gh[:, G:2 * G])
        n = jnp.tanh(gi_t[:, 2 * G:] + r * (gh[:, 2 * G:] + b_hhn))
        h_new = (1.0 - z) * n + z * h
        return h_new, acc + h_new

    h0 = jnp.zeros((Bt, G), jnp.float32)
    a0 = jnp.zeros((Bt, G), jnp.float32)
    _, acc = lax.fori_loop(0, S, step, (h0, a0), unroll=unroll)
    out_ref[...] = acc


def pack_bigru_params(params, in_features, hidden, gate_pad,
                      mxu_dtype=jnp.bfloat16):
    """Pack PyTorch-layout GRU params into the fused, lane-aligned layout.

    Column layout (width 3G): [ r_f r_b pad | z_f z_b pad | n_f n_b pad ].
    The r/z parts of b_hh are folded into b_in (pure adds in the GRU cell);
    only the n-gate part of b_hh stays separate (it is under the r multiply).
    """
    F, H, G = in_features, hidden, gate_pad
    w_in = jnp.zeros((F, 3 * G), jnp.float32)
    w_hh = jnp.zeros((G, 3 * G), jnp.float32)
    b_in = jnp.zeros((1, 3 * G), jnp.float32)
    b_hhn = jnp.zeros((1, G), jnp.float32)
    for d, sfx in enumerate(("f", "b")):                 # 0 = fwd, 1 = bwd
        w_ih = params[f"w_ih_{sfx}"]                     # (3H, F) rows: [r, z, n]
        w_hhd = params[f"w_hh_{sfx}"]                    # (3H, H)
        b_ih = params[f"b_ih_{sfx}"]                     # (3H,)
        b_hhd = params[f"b_hh_{sfx}"]                    # (3H,)
        for g in range(3):                               # r, z, n
            col = g * G + d * H
            rows = slice(g * H, (g + 1) * H)
            w_in = w_in.at[:, col:col + H].set(w_ih[rows, :].T)
            w_hh = w_hh.at[d * H:(d + 1) * H, col:col + H].set(w_hhd[rows, :].T)
            if g < 2:                                    # fold b_hh_{r,z} into b_in
                b_in = b_in.at[0, col:col + H].set(b_ih[rows] + b_hhd[rows])
            else:
                b_in = b_in.at[0, col:col + H].set(b_ih[rows])
                b_hhn = b_hhn.at[0, d * H:(d + 1) * H].set(b_hhd[rows])
    return {"w_in": w_in.astype(mxu_dtype), "w_hh": w_hh.astype(mxu_dtype),
            "b_in": b_in, "b_hhn": b_hhn}


def _vmem_capacity_bytes():
    try:
        return int(pltpu.get_tpu_info().vmem_capacity_bytes)
    except Exception:
        return 64 * 1024 * 1024      # conservative fallback (v7x-sized VMEM)


def graphsage_bigru_forward(x, adj, params, *, b_tile=None,
                            mxu_dtype=jnp.bfloat16):
    """Pallas forward of GraphSAGEWithBiGRU: sum over time of the bi-GRU output."""
    del adj                                    # unused by the reference forward
    S, B, F = x.shape
    H = params["w_hh_f"].shape[1]
    G = _round_up(2 * H, 128)                  # joint fwd+bwd gate width (lane aligned)
    gi_dtype = jnp.bfloat16 if mxu_dtype == jnp.bfloat16 else jnp.float32

    packed = pack_bigru_params(params, F, H, G, mxu_dtype)

    # ---- VMEM- and core-aware batch-tile choice.
    x_item = jnp.dtype(mxu_dtype).itemsize
    gi_item = jnp.dtype(gi_dtype).itemsize
    f_lanes = _round_up(F, 128)                # VMEM tiles are lane-padded
    per_row = (S * 3 * G * gi_item             # gi scratch
               + 2 * S * f_lanes * x_item      # double-buffered x block
               + 2 * G * 4                     # double-buffered out block
               + 6 * G * 4)                    # h/acc carries + gate temporaries
    weight_bytes = ((_round_up(F, 16) + G) * 3 * G) * x_item + 4 * 3 * G + 4 * G
    vmem_cap = _vmem_capacity_bytes()
    budget = int(vmem_cap * 0.7)               # leave pipelining/compiler headroom

    bt_cap = max(16, ((budget - weight_bytes) // max(per_row, 1)) // 16 * 16)
    b_full = _round_up(B, 16)                  # 16-sublane aligned (bf16 packing)
    Bt = b_tile if b_tile is not None else 1024
    Bt = max(16, min(_round_up(Bt, 16), bt_cap, b_full))
    if b_full >= 32 and Bt >= b_full:
        # Keep >= 2 grid programs so both v7x TensorCores get work.
        Bt = _round_up((B + 1) // 2, 16)
    Bp = _round_up(B, Bt)

    xp = x.astype(mxu_dtype)
    if Bp != B:
        xp = jnp.pad(xp, ((0, 0), (0, Bp - B), (0, 0)))

    grid = (Bp // Bt,)
    vmem_need = weight_bytes + Bt * per_row
    vmem_limit = int(min(max(vmem_need * 3 // 2, 32 * 1024 * 1024),
                         vmem_cap * 9 // 10))

    flops = (2 * S * Bp * F * 3 * G            # hoisted input projection
             + 2 * S * Bp * G * 3 * G          # recurrent matmuls
             + 12 * S * Bp * G)                # gate elementwise
    transcendentals = 3 * S * Bp * G
    bytes_accessed = int(xp.size * x_item
                         + sum(int(v.size) * v.dtype.itemsize
                               for v in packed.values())
                         + Bp * G * 4)

    kernel = functools.partial(_bigru_sum_kernel, hidden=H, unroll=min(S, 8))
    const_spec = pl.BlockSpec(memory_space=pltpu.MemorySpace.VMEM)

    out_padded = pl.pallas_call(
        kernel,
        out_shape=jax.ShapeDtypeStruct((Bp, G), jnp.float32),
        grid_spec=pltpu.PrefetchScalarGridSpec(
            num_scalar_prefetch=0,
            grid=grid,
            in_specs=[
                pl.BlockSpec((S, Bt, F), lambda i: (0, i, 0)),
                const_spec,     # w_in   (whole array resident, single-buffered)
                const_spec,     # w_hh
                const_spec,     # b_in
                const_spec,     # b_hhn
            ],
            out_specs=pl.BlockSpec((Bt, G), lambda i: (i, 0)),
            scratch_shapes=[pltpu.VMEM((S, Bt, 3 * G), gi_dtype)],
        ),
        compiler_params=pltpu.CompilerParams(
            dimension_semantics=("parallel",),
            vmem_limit_bytes=vmem_limit),
        cost_estimate=pl.CostEstimate(
            flops=flops,
            transcendentals=transcendentals,
            bytes_accessed=bytes_accessed),
    )(xp, packed["w_in"], packed["w_hh"], packed["b_in"], packed["b_hhn"])

    # Lanes [0:H] hold sum_t h_fwd and [H:2H] hold sum_t h_bwd, which is
    # exactly the PyTorch concat order; strip batch/lane padding.
    return out_padded[:B, :2 * H]


def init_bigru_params(key, in_features, hidden):
    """Deterministic init mimicking nn.GRU's U(-1/sqrt(H), 1/sqrt(H)); PyTorch layout."""
    k = 1.0 / jnp.sqrt(jnp.float32(hidden))
    keys = jax.random.split(key, 8)

    def u(kk, shape):
        return jax.random.uniform(kk, shape, jnp.float32, -k, k)

    return {
        "w_ih_f": u(keys[0], (3 * hidden, in_features)),
        "w_hh_f": u(keys[1], (3 * hidden, hidden)),
        "b_ih_f": u(keys[2], (3 * hidden,)),
        "b_hh_f": u(keys[3], (3 * hidden,)),
        "w_ih_b": u(keys[4], (3 * hidden, in_features)),
        "w_hh_b": u(keys[5], (3 * hidden, hidden)),
        "b_ih_b": u(keys[6], (3 * hidden,)),
        "b_hh_b": u(keys[7], (3 * hidden,)),
    }


def _reference_forward(x, params):
    """Pure-JAX reference of the same bi-GRU + sum-over-time (PyTorch semantics)."""
    S, B, _ = x.shape
    H = params["w_hh_f"].shape[1]

    def run(w_ih, w_hh, b_ih, b_hh, xs):
        wi, wh = w_ih.T, w_hh.T
        bi, bh = b_ih[None, :], b_hh[None, :]

        def step(h, x_t):
            gi = x_t @ wi + bi
            gh = h @ wh + bh
            r = jax.nn.sigmoid(gi[:, :H] + gh[:, :H])
            z = jax.nn.sigmoid(gi[:, H:2 * H] + gh[:, H:2 * H])
            n = jnp.tanh(gi[:, 2 * H:] + r * gh[:, 2 * H:])
            h_new = (1.0 - z) * n + z * h
            return h_new, h_new

        _, hs = lax.scan(step, jnp.zeros((B, H), jnp.float32), xs)
        return hs.sum(axis=0)

    fwd = run(params["w_ih_f"], params["w_hh_f"], params["b_ih_f"],
              params["b_hh_f"], x)
    bwd = run(params["w_ih_b"], params["w_hh_b"], params["b_ih_b"],
              params["b_hh_b"], x[::-1])
    return jnp.concatenate([fwd, bwd], axis=-1)


if __name__ == "__main__":
    key = jax.random.PRNGKey(0)
    k_x, k_p = jax.random.split(key)

    S, B, F, H = 8, 4, 16, 32      # seq_len, batch(nodes), in_features, out_features
    x = jax.random.normal(k_x, (S, B, F), jnp.float32)
    adj = jnp.eye(B, dtype=jnp.float32)   # unused by the forward; kept for API parity
    params = init_bigru_params(k_p, F, H)

    ref = _reference_forward(x, params)

    # f32 MXU-operand path (tight tolerance sanity check).
    out_f32 = jax.block_until_ready(
        graphsage_bigru_forward(x, adj, params, mxu_dtype=jnp.float32))
    # Default fast path: bf16 MXU operands + bf16 gi scratch, f32 gate math.
    out = jax.block_until_ready(graphsage_bigru_forward(x, adj, params))

    assert out.shape == (B, 2 * H) and out_f32.shape == (B, 2 * H)
    assert jnp.allclose(out_f32, ref, atol=1e-2, rtol=1e-2), "f32 path mismatch"
    assert jnp.allclose(out, ref, atol=5e-2, rtol=5e-2), "bf16 path mismatch"

    print("KERNEL_OK")
</pallas_src>

<mosaic_0001>
module attributes {stable_mosaic.version = 11 : i64} {
  func.func @_bigru_sum_kernel(%arg0: i32, %arg1: memref<8x16x16xf32, #tpu.memory_space<vmem>>, %arg2: memref<16x384xf32, #tpu.memory_space<vmem>>, %arg3: memref<128x384xf32, #tpu.memory_space<vmem>>, %arg4: memref<1x384xf32, #tpu.memory_space<vmem>>, %arg5: memref<1x128xf32, #tpu.memory_space<vmem>>, %arg6: memref<16x128xf32, #tpu.memory_space<vmem>>, %arg7: memref<8x16x384xf32, #tpu.memory_space<vmem>>) attributes {dimension_semantics = [#tpu.dimension_semantics<parallel>], iteration_bounds = array<i64: 1>, scalar_prefetch = 0 : i64, scratch_operands = 1 : i64, tpu.core_type = #tpu.core_type<tc>, window_params = [{transform_indices = @transform_0, window_bounds = array<i64: 8, 16, 16>}, {pipeline_mode = #tpu.pipeline_mode<synchronous>, transform_indices = @transform_1, window_bounds = array<i64: 16, 384>}, {pipeline_mode = #tpu.pipeline_mode<synchronous>, transform_indices = @transform_2, window_bounds = array<i64: 128, 384>}, {pipeline_mode = #tpu.pipeline_mode<synchronous>, transform_indices = @transform_3, window_bounds = array<i64: 1, 384>}, {pipeline_mode = #tpu.pipeline_mode<synchronous>, transform_indices = @transform_4, window_bounds = array<i64: 1, 128>}, {transform_indices = @transform_5, window_bounds = array<i64: 16, 128>}]} {
    %c0 = arith.constant 0 : index
    %c0_0 = arith.constant 0 : index
    %c0_1 = arith.constant 0 : index
    %0 = vector.load %arg1[%c0, %c0_0, %c0_1] : memref<8x16x16xf32, #tpu.memory_space<vmem>>, vector<8x16x16xf32>
    %1 = vector.shape_cast %0 : vector<8x16x16xf32> to vector<128x16xf32>
    %c0_2 = arith.constant 0 : index
    %c0_3 = arith.constant 0 : index
    %2 = vector.load %arg2[%c0_2, %c0_3] : memref<16x384xf32, #tpu.memory_space<vmem>>, vector<16x384xf32>
    %cst = arith.constant dense<0.000000e+00> : vector<128x384xf32>
    %3 = tpu.matmul %1, %2, %cst {dimension_numbers = #tpu.dot_dimension_numbers<[1], [0], [0], [1], [0, 0, 1, 1], [], []>} : vector<128x16xf32>, vector<16x384xf32>, vector<128x384xf32> -> vector<128x384xf32>
    %c0_4 = arith.constant 0 : index
    %c0_5 = arith.constant 0 : index
    %4 = vector.load %arg4[%c0_4, %c0_5] : memref<1x384xf32, #tpu.memory_space<vmem>>, vector<1x384xf32>
    %5 = vector.broadcast %4 : vector<1x384xf32> to vector<128x384xf32>
    %6 = arith.addf %3, %5 : vector<128x384xf32>
    %7 = vector.shape_cast %6 : vector<128x384xf32> to vector<8x16x384xf32>
    %c0_6 = arith.constant 0 : index
    %c0_7 = arith.constant 0 : index
    %c0_8 = arith.constant 0 : index
    %8 = vector.load %arg7[%c0_6, %c0_7, %c0_8] : memref<8x16x384xf32, #tpu.memory_space<vmem>>, vector<8x16x384xf32>
    tpu.vector_store %arg7[%c0_6, %c0_7, %c0_8], %7 {strides = array<i32>} : memref<8x16x384xf32, #tpu.memory_space<vmem>>, vector<8x16x384xf32>,
    %c0_9 = arith.constant 0 : index
    %c0_10 = arith.constant 0 : index
    %9 = vector.load %arg3[%c0_9, %c0_10] : memref<128x384xf32, #tpu.memory_space<vmem>>, vector<128x384xf32>
    %c0_11 = arith.constant 0 : index
    %c0_12 = arith.constant 0 : index
    %10 = vector.load %arg5[%c0_11, %c0_12] : memref<1x128xf32, #tpu.memory_space<vmem>>, vector<1x128xf32>
    %11 = tpu.iota {dimensions = array<i32: 1>} : vector<16x384xi32>
    %c128_i32 = arith.constant 128 : i32
    %c0_i32 = arith.constant 0 : i32
    %12 = arith.cmpi eq, %c128_i32, %c0_i32 : i32
    %c1_i32 = arith.constant 1 : i32
    %13 = arith.select %12, %c1_i32, %c128_i32 : i32
    %14 = vector.broadcast %13 : i32 to vector<16x384xi32>
    %15 = arith.remsi %11, %14 : vector<16x384xi32>
    %c0_i32_13 = arith.constant 0 : i32
    %16 = vector.broadcast %c0_i32_13 : i32 to vector<16x384xi32>
    %17 = arith.cmpi ne, %15, %16 : vector<16x384xi32>
    %c0_i32_14 = arith.constant 0 : i32
    %18 = vector.broadcast %c0_i32_14 : i32 to vector<16x384xi32>
    %19 = arith.cmpi slt, %15, %18 : vector<16x384xi32>
    %c0_i32_15 = arith.constant 0 : i32
    %20 = arith.cmpi slt, %13, %c0_i32_15 : i32
    %21 = vector.broadcast %20 : i1 to vector<16x384xi1>
    %22 = vector.broadcast %21 : vector<16x384xi1> to vector<16x384xi1>
    %23 = arith.xori %19, %22 : vector<16x384xi1>
    %24 = arith.andi %23, %17 : vector<16x384xi1>
    %25 = vector.broadcast %13 : i32 to vector<16x384xi32>
    %26 = arith.addi %15, %25 : vector<16x384xi32>
    %27 = arith.select %24, %26, %15 : vector<16x384xi1>, vector<16x384xi32>
    %c32_i32 = arith.constant 32 : i32
    %28 = vector.broadcast %c32_i32 : i32 to vector<16x384xi32>
    %29 = arith.cmpi slt, %27, %28 : vector<16x384xi32>
    %cst_16 = arith.constant 0.000000e+00 : f32
    %30 = vector.broadcast %cst_16 : f32 to vector<16x128xf32>
    %cst_17 = arith.constant 0.000000e+00 : f32
    %31 = vector.broadcast %cst_17 : f32 to vector<16x128xf32>
    %c0_i32_18 = arith.constant 0 : i32
    %32 = arith.index_cast %c0_i32_18 : i32 to index
    %c0_19 = arith.constant 0 : index
    %c0_20 = arith.constant 0 : index
    %33 = vector.load %arg7[%32, %c0_19, %c0_20] : memref<8x16x384xf32, #tpu.memory_space<vmem>>, vector<1x16x384xf32>
    %34 = vector.shape_cast %33 : vector<1x16x384xf32> to vector<16x384xf32>
    %c7_i32 = arith.constant 7 : i32
    %35 = arith.subi %c7_i32, %c0_i32_18 : i32
    %36 = arith.index_cast %35 : i32 to index
    %c0_21 = arith.constant 0 : index
    %c0_22 = arith.constant 0 : index
    %37 = vector.load %arg7[%36, %c0_21, %c0_22] : memref<8x16x384xf32, #tpu.memory_space<vmem>>, vector<1x16x384xf32>
    %38 = vector.shape_cast %37 : vector<1x16x384xf32> to vector<16x384xf32>
    %39 = arith.select %29, %34, %38 : vector<16x384xi1>, vector<16x384xf32>
    %cst_23 = arith.constant dense<0.000000e+00> : vector<16x384xf32>
    %40 = tpu.matmul %30, %9, %cst_23 {dimension_numbers = #tpu.dot_dimension_numbers<[1], [0], [0], [1], [0, 0, 1, 1], [], []>} : vector<16x128xf32>, vector<128x384xf32>, vector<16x384xf32> -> vector<16x384xf32>
    %41 = vector.extract_strided_slice %39 {offsets = [0, 0], sizes = [16, 128], strides = [1, 1]} : vector<16x384xf32> to vector<16x128xf32>
    %42 = vector.extract_strided_slice %40 {offsets = [0, 0], sizes = [16, 128], strides = [1, 1]} : vector<16x384xf32> to vector<16x128xf32>
    %43 = arith.addf %41, %42 : vector<16x128xf32>
    %44 = arith.negf %43 : vector<16x128xf32>
    %45 = math.exp %44 : vector<16x128xf32>
    %cst_24 = arith.constant 1.000000e+00 : f32
    %46 = vector.broadcast %cst_24 : f32 to vector<16x128xf32>
    %47 = arith.addf %46, %45 : vector<16x128xf32>
    %48 = arith.divf %46, %47 : vector<16x128xf32>
    %49 = vector.extract_strided_slice %39 {offsets = [0, 128], sizes = [16, 128], strides = [1, 1]} : vector<16x384xf32> to vector<16x128xf32>
    %50 = vector.extract_strided_slice %40 {offsets = [0, 128], sizes = [16, 128], strides = [1, 1]} : vector<16x384xf32> to vector<16x128xf32>
    %51 = arith.addf %49, %50 : vector<16x128xf32>
    %52 = arith.negf %51 : vector<16x128xf32>
    %53 = math.exp %52 : vector<16x128xf32>
    %cst_25 = arith.constant 1.000000e+00 : f32
    %54 = vector.broadcast %cst_25 : f32 to vector<16x128xf32>
    %55 = arith.addf %54, %53 : vector<16x128xf32>
    %56 = arith.divf %54, %55 : vector<16x128xf32>
    %57 = vector.extract_strided_slice %39 {offsets = [0, 256], sizes = [16, 128], strides = [1, 1]} : vector<16x384xf32> to vector<16x128xf32>
    %58 = vector.extract_strided_slice %40 {offsets = [0, 256], sizes = [16, 128], strides = [1, 1]} : vector<16x384xf32> to vector<16x128xf32>
    %59 = vector.broadcast %10 : vector<1x128xf32> to vector<16x128xf32>
    %60 = arith.addf %58, %59 : vector<16x128xf32>
    %61 = arith.mulf %48, %60 : vector<16x128xf32>
    %62 = arith.addf %57, %61 : vector<16x128xf32>
    %63 = math.tanh %62 : vector<16x128xf32>
    %cst_26 = arith.constant 1.000000e+00 : f32
    %64 = vector.broadcast %cst_26 : f32 to vector<16x128xf32>
    %65 = arith.subf %64, %56 : vector<16x128xf32>
    %66 = arith.mulf %65, %63 : vector<16x128xf32>
    %67 = arith.mulf %56, %30 : vector<16x128xf32>
    %68 = arith.addf %66, %67 : vector<16x128xf32>
    %69 = arith.addf %31, %68 : vector<16x128xf32>
    %c1_i32_27 = arith.constant 1 : i32
    %70 = arith.index_cast %c1_i32_27 : i32 to index
    %c0_28 = arith.constant 0 : index
    %c0_29 = arith.constant 0 : index
    %71 = vector.load %arg7[%70, %c0_28, %c0_29] : memref<8x16x384xf32, #tpu.memory_space<vmem>>, vector<1x16x384xf32>
    %72 = vector.shape_cast %71 : vector<1x16x384xf32> to vector<16x384xf32>
    %c7_i32_30 = arith.constant 7 : i32
    %73 = arith.subi %c7_i32_30, %c1_i32_27 : i32
    %74 = arith.index_cast %73 : i32 to index
    %c0_31 = arith.constant 0 : index
    %c0_32 = arith.constant 0 : index
    %75 = vector.load %arg7[%74, %c0_31, %c0_32] : memref<8x16x384xf32, #tpu.memory_space<vmem>>, vector<1x16x384xf32>
    %76 = vector.shape_cast %75 : vector<1x16x384xf32> to vector<16x384xf32>
    %77 = arith.select %29, %72, %76 : vector<16x384xi1>, vector<16x384xf32>
    %cst_33 = arith.constant dense<0.000000e+00> : vector<16x384xf32>
    %78 = tpu.matmul %68, %9, %cst_33 {dimension_numbers = #tpu.dot_dimension_numbers<[1], [0], [0], [1], [0, 0, 1, 1], [], []>} : vector<16x128xf32>, vector<128x384xf32>, vector<16x384xf32> -> vector<16x384xf32>
    %79 = vector.extract_strided_slice %77 {offsets = [0, 0], sizes = [16, 128], strides = [1, 1]} : vector<16x384xf32> to vector<16x128xf32>
    %80 = vector.extract_strided_slice %78 {offsets = [0, 0], sizes = [16, 128], strides = [1, 1]} : vector<16x384xf32> to vector<16x128xf32>
    %81 = arith.addf %79, %80 : vector<16x128xf32>
    %82 = arith.negf %81 : vector<16x128xf32>
    %83 = math.exp %82 : vector<16x128xf32>
    %cst_34 = arith.constant 1.000000e+00 : f32
    %84 = vector.broadcast %cst_34 : f32 to vector<16x128xf32>
    %85 = arith.addf %84, %83 : vector<16x128xf32>
    %86 = arith.divf %84, %85 : vector<16x128xf32>
    %87 = vector.extract_strided_slice %77 {offsets = [0, 128], sizes = [16, 128], strides = [1, 1]} : vector<16x384xf32> to vector<16x128xf32>
    %88 = vector.extract_strided_slice %78 {offsets = [0, 128], sizes = [16, 128], strides = [1, 1]} : vector<16x384xf32> to vector<16x128xf32>
    %89 = arith.addf %87, %88 : vector<16x128xf32>
    %90 = arith.negf %89 : vector<16x128xf32>
    %91 = math.exp %90 : vector<16x128xf32>
    %cst_35 = arith.constant 1.000000e+00 : f32
    %92 = vector.broadcast %cst_35 : f32 to vector<16x128xf32>
    %93 = arith.addf %92, %91 : vector<16x128xf32>
    %94 = arith.divf %92, %93 : vector<16x128xf32>
    %95 = vector.extract_strided_slice %77 {offsets = [0, 256], sizes = [16, 128], strides = [1, 1]} : vector<16x384xf32> to vector<16x128xf32>
    %96 = vector.extract_strided_slice %78 {offsets = [0, 256], sizes = [16, 128], strides = [1, 1]} : vector<16x384xf32> to vector<16x128xf32>
    %97 = vector.broadcast %10 : vector<1x128xf32> to vector<16x128xf32>
    %98 = arith.addf %96, %97 : vector<16x128xf32>
    %99 = arith.mulf %86, %98 : vector<16x128xf32>
    %100 = arith.addf %95, %99 : vector<16x128xf32>
    %101 = math.tanh %100 : vector<16x128xf32>
    %cst_36 = arith.constant 1.000000e+00 : f32
    %102 = vector.broadcast %cst_36 : f32 to vector<16x128xf32>
    %103 = arith.subf %102, %94 : vector<16x128xf32>
    %104 = arith.mulf %103, %101 : vector<16x128xf32>
    %105 = arith.mulf %94, %68 : vector<16x128xf32>
    %106 = arith.addf %104, %105 : vector<16x128xf32>
    %107 = arith.addf %69, %106 : vector<16x128xf32>
    %c2_i32 = arith.constant 2 : i32
    %108 = arith.index_cast %c2_i32 : i32 to index
    %c0_37 = arith.constant 0 : index
    %c0_38 = arith.constant 0 : index
    %109 = vector.load %arg7[%108, %c0_37, %c0_38] : memref<8x16x384xf32, #tpu.memory_space<vmem>>, vector<1x16x384xf32>
    %110 = vector.shape_cast %109 : vector<1x16x384xf32> to vector<16x384xf32>
    %c7_i32_39 = arith.constant 7 : i32
    %111 = arith.subi %c7_i32_39, %c2_i32 : i32
    %112 = arith.index_cast %111 : i32 to index
    %c0_40 = arith.constant 0 : index
    %c0_41 = arith.constant 0 : index
    %113 = vector.load %arg7[%112, %c0_40, %c0_41] : memref<8x16x384xf32, #tpu.memory_space<vmem>>, vector<1x16x384xf32>
    %114 = vector.shape_cast %113 : vector<1x16x384xf32> to vector<16x384xf32>
    %115 = arith.select %29, %110, %114 : vector<16x384xi1>, vector<16x384xf32>
    %cst_42 = arith.constant dense<0.000000e+00> : vector<16x384xf32>
    %116 = tpu.matmul %106, %9, %cst_42 {dimension_numbers = #tpu.dot_dimension_numbers<[1], [0], [0], [1], [0, 0, 1, 1], [], []>} : vector<16x128xf32>, vector<128x384xf32>, vector<16x384xf32> -> vector<16x384xf32>
    %117 = vector.extract_strided_slice %115 {offsets = [0, 0], sizes = [16, 128], strides = [1, 1]} : vector<16x384xf32> to vector<16x128xf32>
    %118 = vector.extract_strided_slice %116 {offsets = [0, 0], sizes = [16, 128], strides = [1, 1]} : vector<16x384xf32> to vector<16x128xf32>
    %119 = arith.addf %117, %118 : vector<16x128xf32>
    %120 = arith.negf %119 : vector<16x128xf32>
    %121 = math.exp %120 : vector<16x128xf32>
    %cst_43 = arith.constant 1.000000e+00 : f32
    %122 = vector.broadcast %cst_43 : f32 to vector<16x128xf32>
    %123 = arith.addf %122, %121 : vector<16x128xf32>
    %124 = arith.divf %122, %123 : vector<16x128xf32>
    %125 = vector.extract_strided_slice %115 {offsets = [0, 128], sizes = [16, 128], strides = [1, 1]} : vector<16x384xf32> to vector<16x128xf32>
    %126 = vector.extract_strided_slice %116 {offsets = [0, 128], sizes = [16, 128], strides = [1, 1]} : vector<16x384xf32> to vector<16x128xf32>
    %127 = arith.addf %125, %126 : vector<16x128xf32>
    %128 = arith.negf %127 : vector<16x128xf32>
    %129 = math.exp %128 : vector<16x128xf32>
    %cst_44 = arith.constant 1.000000e+00 : f32
    %130 = vector.broadcast %cst_44 : f32 to vector<16x128xf32>
    %131 = arith.addf %130, %129 : vector<16x128xf32>
    %132 = arith.divf %130, %131 : vector<16x128xf32>
    %133 = vector.extract_strided_slice %115 {offsets = [0, 256], sizes = [16, 128], strides = [1, 1]} : vector<16x384xf32> to vector<16x128xf32>
    %134 = vector.extract_strided_slice %116 {offsets = [0, 256], sizes = [16, 128], strides = [1, 1]} : vector<16x384xf32> to vector<16x128xf32>
    %135 = vector.broadcast %10 : vector<1x128xf32> to vector<16x128xf32>
    %136 = arith.addf %134, %135 : vector<16x128xf32>
    %137 = arith.mulf %124, %136 : vector<16x128xf32>
    %138 = arith.addf %133, %137 : vector<16x128xf32>
    %139 = math.tanh %138 : vector<16x128xf32>
    %cst_45 = arith.constant 1.000000e+00 : f32
    %140 = vector.broadcast %cst_45 : f32 to vector<16x128xf32>
    %141 = arith.subf %140, %132 : vector<16x128xf32>
    %142 = arith.mulf %141, %139 : vector<16x128xf32>
    %143 = arith.mulf %132, %106 : vector<16x128xf32>
    %144 = arith.addf %142, %143 : vector<16x128xf32>
    %145 = arith.addf %107, %144 : vector<16x128xf32>
    %c3_i32 = arith.constant 3 : i32
    %146 = arith.index_cast %c3_i32 : i32 to index
    %c0_46 = arith.constant 0 : index
    %c0_47 = arith.constant 0 : index
    %147 = vector.load %arg7[%146, %c0_46, %c0_47] : memref<8x16x384xf32, #tpu.memory_space<vmem>>, vector<1x16x384xf32>
    %148 = vector.shape_cast %147 : vector<1x16x384xf32> to vector<16x384xf32>
    %c7_i32_48 = arith.constant 7 : i32
    %149 = arith.subi %c7_i32_48, %c3_i32 : i32
    %150 = arith.index_cast %149 : i32 to index
    %c0_49 = arith.constant 0 : index
    %c0_50 = arith.constant 0 : index
    %151 = vector.load %arg7[%150, %c0_49, %c0_50] : memref<8x16x384xf32, #tpu.memory_space<vmem>>, vector<1x16x384xf32>
    %152 = vector.shape_cast %151 : vector<1x16x384xf32> to vector<16x384xf32>
    %153 = arith.select %29, %148, %152 : vector<16x384xi1>, vector<16x384xf32>
    %cst_51 = arith.constant dense<0.000000e+00> : vector<16x384xf32>
    %154 = tpu.matmul %144, %9, %cst_51 {dimension_numbers = #tpu.dot_dimension_numbers<[1], [0], [0], [1], [0, 0, 1, 1], [], []>} : vector<16x128xf32>, vector<128x384xf32>, vector<16x384xf32> -> vector<16x384xf32>
    %155 = vector.extract_strided_slice %153 {offsets = [0, 0], sizes = [16, 128], strides = [1, 1]} : vector<16x384xf32> to vector<16x128xf32>
    %156 = vector.extract_strided_slice %154 {offsets = [0, 0], sizes = [16, 128], strides = [1, 1]} : vector<16x384xf32> to vector<16x128xf32>
    %157 = arith.addf %155, %156 : vector<16x128xf32>
    %158 = arith.negf %157 : vector<16x128xf32>
    %159 = math.exp %158 : vector<16x128xf32>
    %cst_52 = arith.constant 1.000000e+00 : f32
    %160 = vector.broadcast %cst_52 : f32 to vector<16x128xf32>
    %161 = arith.addf %160, %159 : vector<16x128xf32>
    %162 = arith.divf %160, %161 : vector<16x128xf32>
    %163 = vector.extract_strided_slice %153 {offsets = [0, 128], sizes = [16, 128], strides = [1, 1]} : vector<16x384xf32> to vector<16x128xf32>
    %164 = vector.extract_strided_slice %154 {offsets = [0, 128], sizes = [16, 128], strides = [1, 1]} : vector<16x384xf32> to vector<16x128xf32>
    %165 = arith.addf %163, %164 : vector<16x128xf32>
    %166 = arith.negf %165 : vector<16x128xf32>
    %167 = math.exp %166 : vector<16x128xf32>
    %cst_53 = arith.constant 1.000000e+00 : f32
    %168 = vector.broadcast %cst_53 : f32 to vector<16x128xf32>
    %169 = arith.addf %168, %167 : vector<16x128xf32>
    %170 = arith.divf %168, %169 : vector<16x128xf32>
    %171 = vector.extract_strided_slice %153 {offsets = [0, 256], sizes = [16, 128], strides = [1, 1]} : vector<16x384xf32> to vector<16x128xf32>
    %172 = vector.extract_strided_slice %154 {offsets = [0, 256], sizes = [16, 128], strides = [1, 1]} : vector<16x384xf32> to vector<16x128xf32>
    %173 = vector.broadcast %10 : vector<1x128xf32> to vector<16x128xf32>
    %174 = arith.addf %172, %173 : vector<16x128xf32>
    %175 = arith.mulf %162, %174 : vector<16x128xf32>
    %176 = arith.addf %171, %175 : vector<16x128xf32>
    %177 = math.tanh %176 : vector<16x128xf32>
    %cst_54 = arith.constant 1.000000e+00 : f32
    %178 = vector.broadcast %cst_54 : f32 to vector<16x128xf32>
    %179 = arith.subf %178, %170 : vector<16x128xf32>
    %180 = arith.mulf %179, %177 : vector<16x128xf32>
    %181 = arith.mulf %170, %144 : vector<16x128xf32>
    %182 = arith.addf %180, %181 : vector<16x128xf32>
    %183 = arith.addf %145, %182 : vector<16x128xf32>
    %c4_i32 = arith.constant 4 : i32
    %184 = arith.index_cast %c4_i32 : i32 to index
    %c0_55 = arith.constant 0 : index
    %c0_56 = arith.constant 0 : index
    %185 = vector.load %arg7[%184, %c0_55, %c0_56] : memref<8x16x384xf32, #tpu.memory_space<vmem>>, vector<1x16x384xf32>
    %186 = vector.shape_cast %185 : vector<1x16x384xf32> to vector<16x384xf32>
    %c7_i32_57 = arith.constant 7 : i32
    %187 = arith.subi %c7_i32_57, %c4_i32 : i32
    %188 = arith.index_cast %187 : i32 to index
    %c0_58 = arith.constant 0 : index
    %c0_59 = arith.constant 0 : index
    %189 = vector.load %arg7[%188, %c0_58, %c0_59] : memref<8x16x384xf32, #tpu.memory_space<vmem>>, vector<1x16x384xf32>
    %190 = vector.shape_cast %189 : vector<1x16x384xf32> to vector<16x384xf32>
    %191 = arith.select %29, %186, %190 : vector<16x384xi1>, vector<16x384xf32>
    %cst_60 = arith.constant dense<0.000000e+00> : vector<16x384xf32>
    %192 = tpu.matmul %182, %9, %cst_60 {dimension_numbers = #tpu.dot_dimension_numbers<[1], [0], [0], [1], [0, 0, 1, 1], [], []>} : vector<16x128xf32>, vector<128x384xf32>, vector<16x384xf32> -> vector<16x384xf32>
    %193 = vector.extract_strided_slice %191 {offsets = [0, 0], sizes = [16, 128], strides = [1, 1]} : vector<16x384xf32> to vector<16x128xf32>
    %194 = vector.extract_strided_slice %192 {offsets = [0, 0], sizes = [16, 128], strides = [1, 1]} : vector<16x384xf32> to vector<16x128xf32>
    %195 = arith.addf %193, %194 : vector<16x128xf32>
    %196 = arith.negf %195 : vector<16x128xf32>
    %197 = math.exp %196 : vector<16x128xf32>
    %cst_61 = arith.constant 1.000000e+00 : f32
    %198 = vector.broadcast %cst_61 : f32 to vector<16x128xf32>
    %199 = arith.addf %198, %197 : vector<16x128xf32>
    %200 = arith.divf %198, %199 : vector<16x128xf32>
    %201 = vector.extract_strided_slice %191 {offsets = [0, 128], sizes = [16, 128], strides = [1, 1]} : vector<16x384xf32> to vector<16x128xf32>
    %202 = vector.extract_strided_slice %192 {offsets = [0, 128], sizes = [16, 128], strides = [1, 1]} : vector<16x384xf32> to vector<16x128xf32>
    %203 = arith.addf %201, %202 : vector<16x128xf32>
    %204 = arith.negf %203 : vector<16x128xf32>
    %205 = math.exp %204 : vector<16x128xf32>
    %cst_62 = arith.constant 1.000000e+00 : f32
    %206 = vector.broadcast %cst_62 : f32 to vector<16x128xf32>
    %207 = arith.addf %206, %205 : vector<16x128xf32>
    %208 = arith.divf %206, %207 : vector<16x128xf32>
    %209 = vector.extract_strided_slice %191 {offsets = [0, 256], sizes = [16, 128], strides = [1, 1]} : vector<16x384xf32> to vector<16x128xf32>
    %210 = vector.extract_strided_slice %192 {offsets = [0, 256], sizes = [16, 128], strides = [1, 1]} : vector<16x384xf32> to vector<16x128xf32>
    %211 = vector.broadcast %10 : vector<1x128xf32> to vector<16x128xf32>
    %212 = arith.addf %210, %211 : vector<16x128xf32>
    %213 = arith.mulf %200, %212 : vector<16x128xf32>
    %214 = arith.addf %209, %213 : vector<16x128xf32>
    %215 = math.tanh %214 : vector<16x128xf32>
    %cst_63 = arith.constant 1.000000e+00 : f32
    %216 = vector.broadcast %cst_63 : f32 to vector<16x128xf32>
    %217 = arith.subf %216, %208 : vector<16x128xf32>
    %218 = arith.mulf %217, %215 : vector<16x128xf32>
    %219 = arith.mulf %208, %182 : vector<16x128xf32>
    %220 = arith.addf %218, %219 : vector<16x128xf32>
    %221 = arith.addf %183, %220 : vector<16x128xf32>
    %c5_i32 = arith.constant 5 : i32
    %222 = arith.index_cast %c5_i32 : i32 to index
    %c0_64 = arith.constant 0 : index
    %c0_65 = arith.constant 0 : index
    %223 = vector.load %arg7[%222, %c0_64, %c0_65] : memref<8x16x384xf32, #tpu.memory_space<vmem>>, vector<1x16x384xf32>
    %224 = vector.shape_cast %223 : vector<1x16x384xf32> to vector<16x384xf32>
    %c7_i32_66 = arith.constant 7 : i32
    %225 = arith.subi %c7_i32_66, %c5_i32 : i32
    %226 = arith.index_cast %225 : i32 to index
    %c0_67 = arith.constant 0 : index
    %c0_68 = arith.constant 0 : index
    %227 = vector.load %arg7[%226, %c0_67, %c0_68] : memref<8x16x384xf32, #tpu.memory_space<vmem>>, vector<1x16x384xf32>
    %228 = vector.shape_cast %227 : vector<1x16x384xf32> to vector<16x384xf32>
    %229 = arith.select %29, %224, %228 : vector<16x384xi1>, vector<16x384xf32>
    %cst_69 = arith.constant dense<0.000000e+00> : vector<16x384xf32>
    %230 = tpu.matmul %220, %9, %cst_69 {dimension_numbers = #tpu.dot_dimension_numbers<[1], [0], [0], [1], [0, 0, 1, 1], [], []>} : vector<16x128xf32>, vector<128x384xf32>, vector<16x384xf32> -> vector<16x384xf32>
    %231 = vector.extract_strided_slice %229 {offsets = [0, 0], sizes = [16, 128], strides = [1, 1]} : vector<16x384xf32> to vector<16x128xf32>
    %232 = vector.extract_strided_slice %230 {offsets = [0, 0], sizes = [16, 128], strides = [1, 1]} : vector<16x384xf32> to vector<16x128xf32>
    %233 = arith.addf %231, %232 : vector<16x128xf32>
    %234 = arith.negf %233 : vector<16x128xf32>
    %235 = math.exp %234 : vector<16x128xf32>
    %cst_70 = arith.constant 1.000000e+00 : f32
    %236 = vector.broadcast %cst_70 : f32 to vector<16x128xf32>
    %237 = arith.addf %236, %235 : vector<16x128xf32>
    %238 = arith.divf %236, %237 : vector<16x128xf32>
    %239 = vector.extract_strided_slice %229 {offsets = [0, 128], sizes = [16, 128], strides = [1, 1]} : vector<16x384xf32> to vector<16x128xf32>
    %240 = vector.extract_strided_slice %230 {offsets = [0, 128], sizes = [16, 128], strides = [1, 1]} : vector<16x384xf32> to vector<16x128xf32>
    %241 = arith.addf %239, %240 : vector<16x128xf32>
    %242 = arith.negf %241 : vector<16x128xf32>
    %243 = math.exp %242 : vector<16x128xf32>
    %cst_71 = arith.constant 1.000000e+00 : f32
    %244 = vector.broadcast %cst_71 : f32 to vector<16x128xf32>
    %245 = arith.addf %244, %243 : vector<16x128xf32>
    %246 = arith.divf %244, %245 : vector<16x128xf32>
    %247 = vector.extract_strided_slice %229 {offsets = [0, 256], sizes = [16, 128], strides = [1, 1]} : vector<16x384xf32> to vector<16x128xf32>
    %248 = vector.extract_strided_slice %230 {offsets = [0, 256], sizes = [16, 128], strides = [1, 1]} : vector<16x384xf32> to vector<16x128xf32>
    %249 = vector.broadcast %10 : vector<1x128xf32> to vector<16x128xf32>
    %250 = arith.addf %248, %249 : vector<16x128xf32>
    %251 = arith.mulf %238, %250 : vector<16x128xf32>
    %252 = arith.addf %247, %251 : vector<16x128xf32>
    %253 = math.tanh %252 : vector<16x128xf32>
    %cst_72 = arith.constant 1.000000e+00 : f32
    %254 = vector.broadcast %cst_72 : f32 to vector<16x128xf32>
    %255 = arith.subf %254, %246 : vector<16x128xf32>
    %256 = arith.mulf %255, %253 : vector<16x128xf32>
    %257 = arith.mulf %246, %220 : vector<16x128xf32>
    %258 = arith.addf %256, %257 : vector<16x128xf32>
    %259 = arith.addf %221, %258 : vector<16x128xf32>
    %c6_i32 = arith.constant 6 : i32
    %260 = arith.index_cast %c6_i32 : i32 to index
    %c0_73 = arith.constant 0 : index
    %c0_74 = arith.constant 0 : index
    %261 = vector.load %arg7[%260, %c0_73, %c0_74] : memref<8x16x384xf32, #tpu.memory_space<vmem>>, vector<1x16x384xf32>
    %262 = vector.shape_cast %261 : vector<1x16x384xf32> to vector<16x384xf32>
    %c7_i32_75 = arith.constant 7 : i32
    %263 = arith.subi %c7_i32_75, %c6_i32 : i32
    %264 = arith.index_cast %263 : i32 to index
    %c0_76 = arith.constant 0 : index
    %c0_77 = arith.constant 0 : index
    %265 = vector.load %arg7[%264, %c0_76, %c0_77] : memref<8x16x384xf32, #tpu.memory_space<vmem>>, vector<1x16x384xf32>
    %266 = vector.shape_cast %265 : vector<1x16x384xf32> to vector<16x384xf32>
    %267 = arith.select %29, %262, %266 : vector<16x384xi1>, vector<16x384xf32>
    %cst_78 = arith.constant dense<0.000000e+00> : vector<16x384xf32>
    %268 = tpu.matmul %258, %9, %cst_78 {dimension_numbers = #tpu.dot_dimension_numbers<[1], [0], [0], [1], [0, 0, 1, 1], [], []>} : vector<16x128xf32>, vector<128x384xf32>, vector<16x384xf32> -> vector<16x384xf32>
    %269 = vector.extract_strided_slice %267 {offsets = [0, 0], sizes = [16, 128], strides = [1, 1]} : vector<16x384xf32> to vector<16x128xf32>
    %270 = vector.extract_strided_slice %268 {offsets = [0, 0], sizes = [16, 128], strides = [1, 1]} : vector<16x384xf32> to vector<16x128xf32>
    %271 = arith.addf %269, %270 : vector<16x128xf32>
    %272 = arith.negf %271 : vector<16x128xf32>
    %273 = math.exp %272 : vector<16x128xf32>
    %cst_79 = arith.constant 1.000000e+00 : f32
    %274 = vector.broadcast %cst_79 : f32 to vector<16x128xf32>
    %275 = arith.addf %274, %273 : vector<16x128xf32>
    %276 = arith.divf %274, %275 : vector<16x128xf32>
    %277 = vector.extract_strided_slice %267 {offsets = [0, 128], sizes = [16, 128], strides = [1, 1]} : vector<16x384xf32> to vector<16x128xf32>
    %278 = vector.extract_strided_slice %268 {offsets = [0, 128], sizes = [16, 128], strides = [1, 1]} : vector<16x384xf32> to vector<16x128xf32>
    %279 = arith.addf %277, %278 : vector<16x128xf32>
    %280 = arith.negf %279 : vector<16x128xf32>
    %281 = math.exp %280 : vector<16x128xf32>
    %cst_80 = arith.constant 1.000000e+00 : f32
    %282 = vector.broadcast %cst_80 : f32 to vector<16x128xf32>
    %283 = arith.addf %282, %281 : vector<16x128xf32>
    %284 = arith.divf %282, %283 : vector<16x128xf32>
    %285 = vector.extract_strided_slice %267 {offsets = [0, 256], sizes = [16, 128], strides = [1, 1]} : vector<16x384xf32> to vector<16x128xf32>
    %286 = vector.extract_strided_slice %268 {offsets = [0, 256], sizes = [16, 128], strides = [1, 1]} : vector<16x384xf32> to vector<16x128xf32>
    %287 = vector.broadcast %10 : vector<1x128xf32> to vector<16x128xf32>
    %288 = arith.addf %286, %287 : vector<16x128xf32>
    %289 = arith.mulf %276, %288 : vector<16x128xf32>
    %290 = arith.addf %285, %289 : vector<16x128xf32>
    %291 = math.tanh %290 : vector<16x128xf32>
    %cst_81 = arith.constant 1.000000e+00 : f32
    %292 = vector.broadcast %cst_81 : f32 to vector<16x128xf32>
    %293 = arith.subf %292, %284 : vector<16x128xf32>
    %294 = arith.mulf %293, %291 : vector<16x128xf32>
    %295 = arith.mulf %284, %258 : vector<16x128xf32>
    %296 = arith.addf %294, %295 : vector<16x128xf32>
    %297 = arith.addf %259, %296 : vector<16x128xf32>
    %c7_i32_82 = arith.constant 7 : i32
    %298 = arith.index_cast %c7_i32_82 : i32 to index
    %c0_83 = arith.constant 0 : index
    %c0_84 = arith.constant 0 : index
    %299 = vector.load %arg7[%298, %c0_83, %c0_84] : memref<8x16x384xf32, #tpu.memory_space<vmem>>, vector<1x16x384xf32>
    %300 = vector.shape_cast %299 : vector<1x16x384xf32> to vector<16x384xf32>
    %c7_i32_85 = arith.constant 7 : i32
    %301 = arith.subi %c7_i32_85, %c7_i32_82 : i32
    %302 = arith.index_cast %301 : i32 to index
    %c0_86 = arith.constant 0 : index
    %c0_87 = arith.constant 0 : index
    %303 = vector.load %arg7[%302, %c0_86, %c0_87] : memref<8x16x384xf32, #tpu.memory_space<vmem>>, vector<1x16x384xf32>
    %304 = vector.shape_cast %303 : vector<1x16x384xf32> to vector<16x384xf32>
    %305 = arith.select %29, %300, %304 : vector<16x384xi1>, vector<16x384xf32>
    %cst_88 = arith.constant dense<0.000000e+00> : vector<16x384xf32>
    %306 = tpu.matmul %296, %9, %cst_88 {dimension_numbers = #tpu.dot_dimension_numbers<[1], [0], [0], [1], [0, 0, 1, 1], [], []>} : vector<16x128xf32>, vector<128x384xf32>, vector<16x384xf32> -> vector<16x384xf32>
    %307 = vector.extract_strided_slice %305 {offsets = [0, 0], sizes = [16, 128], strides = [1, 1]} : vector<16x384xf32> to vector<16x128xf32>
    %308 = vector.extract_strided_slice %306 {offsets = [0, 0], sizes = [16, 128], strides = [1, 1]} : vector<16x384xf32> to vector<16x128xf32>
    %309 = arith.addf %307, %308 : vector<16x128xf32>
    %310 = arith.negf %309 : vector<16x128xf32>
    %311 = math.exp %310 : vector<16x128xf32>
    %cst_89 = arith.constant 1.000000e+00 : f32
    %312 = vector.broadcast %cst_89 : f32 to vector<16x128xf32>
    %313 = arith.addf %312, %311 : vector<16x128xf32>
    %314 = arith.divf %312, %313 : vector<16x128xf32>
    %315 = vector.extract_strided_slice %305 {offsets = [0, 128], sizes = [16, 128], strides = [1, 1]} : vector<16x384xf32> to vector<16x128xf32>
    %316 = vector.extract_strided_slice %306 {offsets = [0, 128], sizes = [16, 128], strides = [1, 1]} : vector<16x384xf32> to vector<16x128xf32>
    %317 = arith.addf %315, %316 : vector<16x128xf32>
    %318 = arith.negf %317 : vector<16x128xf32>
    %319 = math.exp %318 : vector<16x128xf32>
    %cst_90 = arith.constant 1.000000e+00 : f32
    %320 = vector.broadcast %cst_90 : f32 to vector<16x128xf32>
    %321 = arith.addf %320, %319 : vector<16x128xf32>
    %322 = arith.divf %320, %321 : vector<16x128xf32>
    %323 = vector.extract_strided_slice %305 {offsets = [0, 256], sizes = [16, 128], strides = [1, 1]} : vector<16x384xf32> to vector<16x128xf32>
    %324 = vector.extract_strided_slice %306 {offsets = [0, 256], sizes = [16, 128], strides = [1, 1]} : vector<16x384xf32> to vector<16x128xf32>
    %325 = vector.broadcast %10 : vector<1x128xf32> to vector<16x128xf32>
    %326 = arith.addf %324, %325 : vector<16x128xf32>
    %327 = arith.mulf %314, %326 : vector<16x128xf32>
    %328 = arith.addf %323, %327 : vector<16x128xf32>
    %329 = math.tanh %328 : vector<16x128xf32>
    %cst_91 = arith.constant 1.000000e+00 : f32
    %330 = vector.broadcast %cst_91 : f32 to vector<16x128xf32>
    %331 = arith.subf %330, %322 : vector<16x128xf32>
    %332 = arith.mulf %331, %329 : vector<16x128xf32>
    %333 = arith.mulf %322, %296 : vector<16x128xf32>
    %334 = arith.addf %332, %333 : vector<16x128xf32>
    %335 = arith.addf %297, %334 : vector<16x128xf32>
    %c8_i32 = arith.constant 8 : i32
    %c0_92 = arith.constant 0 : index
    %c0_93 = arith.constant 0 : index
    %336 = vector.load %arg6[%c0_92, %c0_93] : memref<16x128xf32, #tpu.memory_space<vmem>>, vector<16x128xf32>
    tpu.vector_store %arg6[%c0_92, %c0_93], %335 {strides = array<i32>} : memref<16x128xf32, #tpu.memory_space<vmem>>, vector<16x128xf32>,
    return
  }
  func.func @transform_0(%arg0: i32) -> (i32, i32, i32) {
    %c0_i32 = arith.constant 0 : i32
    %c0_i32_0 = arith.constant 0 : i32
    %c0_i32_1 = arith.constant 0 : i32
    return %c0_i32, %arg0, %c0_i32_0 : i32, i32, i32
  }
  func.func @transform_1(%arg0: i32) -> (i32, i32) {
    %c0_i32 = arith.constant 0 : i32
    %c0_i32_0 = arith.constant 0 : i32
    %c0_i32_1 = arith.constant 0 : i32
    return %c0_i32, %c0_i32_0 : i32, i32
  }
  func.func @transform_2(%arg0: i32) -> (i32, i32) {
    %c0_i32 = arith.constant 0 : i32
    %c0_i32_0 = arith.constant 0 : i32
    %c0_i32_1 = arith.constant 0 : i32
    return %c0_i32, %c0_i32_0 : i32, i32
  }
  func.func @transform_3(%arg0: i32) -> (i32, i32) {
    %c0_i32 = arith.constant 0 : i32
    %c0_i32_0 = arith.constant 0 : i32
    %c0_i32_1 = arith.constant 0 : i32
    return %c0_i32, %c0_i32_0 : i32, i32
  }
  func.func @transform_4(%arg0: i32) -> (i32, i32) {
    %c0_i32 = arith.constant 0 : i32
    %c0_i32_0 = arith.constant 0 : i32
    %c0_i32_1 = arith.constant 0 : i32
    return %c0_i32, %c0_i32_0 : i32, i32
  }
  func.func @transform_5(%arg0: i32) -> (i32, i32) {
    %c0_i32 = arith.constant 0 : i32
    %c0_i32_0 = arith.constant 0 : i32
    return %arg0, %c0_i32 : i32, i32
  }
}

</mosaic_0001>

<bundles_post_ra>
// kernel: tpu_custom_call.1
= control target key start
LH: loop header
LB: loop body
LE: loop exit
PB: predicated region body
PF: predicated region fallthrough
CT: control target
= control target key end

     0   :  { %10 = vsyncpa [#allocation4], 0  ;;  %s4738_s0 = inlined_call_operand.hbm [shape: f32[8,16,16], index: 0, kind: input, shape index: {}]   ;;  %s4739_s1 = inlined_call_operand.hbm [shape: f32[16,384], index: 1, kind: input, shape index: {}]   ;;  %s4740_s2 = inlined_call_operand.hbm [shape: f32[128,384], index: 2, kind: input, shape index: {}]   ;;  %s4741_s3 = inlined_call_operand.vmem [shape: f32[1,384], index: 3, kind: input, shape index: {}]   ;;  %s4742_s4 = inlined_call_operand.vmem [shape: f32[1,128], index: 4, kind: input, shape index: {}]   ;;  %s4743_s5 = inlined_call_operand.hbm [shape: f32[16,128], index: 5, kind: output, shape index: {}]  }
   0x1   :  { %11 = vsyncpa [#allocation7], 0 }
   0x2   :  { %12 = vsyncpa [#allocation5], 0  ;;  %s3630_s18 = smov [#allocation6]   ;;  %s3536_s22 = scalar_lea.hbm %s4739_s1, 768 }
   0x3   :  { %s30_s19 = sshll.u32 %s3630_s18, 4  ;;  %p3537_p0 = scmp.ne.s32.totalorder %s4739_s1, %s3536_s22  ;;  %s31_s19 = int_to_ptr.vmem [resolvable:$true] %s30_s19 }
   0x4   :  { %p3540_p1 = scmp.lt.u32.totalorder %s3536_s22, %s4739_s1 }
   0x6   :  { %p3542_p2 = pnand %p3540_p1, %p3537_p0 }
   0x8   :  { %3545 = shalt.err (!%p3542_p2)
}
   0x9   :  { %s3546_s27 = scalar_lea.vmem %s31_s19, 768  ;;  %p3551_p4 = scmp.lt.s32.totalorder %s31_s19, %s31_s19 }
   0xa   :  { %p3547_p3 = scmp.ne.s32.totalorder %s31_s19, %s3546_s27  ;;  %p3552_p5 = scmp.lt.s32.totalorder %s3546_s27, %s3546_s27 }
   0xc   :  { %p3553_p6 = por %p3552_p5, %p3551_p4 }
   0xe   :  { %p3554_p7 = pnand %p3553_p6, %p3547_p3 }
  0x10   :  { %3557 = shalt.err (!%p3554_p7)
}
  0x11   :  { %s3631_s28 = smov 384   ;;  %s3632_s29 = smov 24  }
  0x12   :  { %36 = dma.hbm_to_vmem [thread:$0]  %s4739_s1, 768, %s31_s19, [#allocation7], %s3631_s28, %s3631_s28, %s3632_s29  }
  0x13   :  { %s3633_s7 = smov [#allocation3]   ;;  %s3558_s11 = scalar_lea.hbm %s4738_s0, 2048 }
  0x14   :  { %s18_s8 = sshll.u32 %s3633_s7, 4  ;;  %p3559_p8 = scmp.ne.s32.totalorder %s4738_s0, %s3558_s11  ;;  %s19_s8 = int_to_ptr.vmem [resolvable:$true] %s18_s8 }
  0x15   :  { %p3562_p9 = scmp.lt.u32.totalorder %s3558_s11, %s4738_s0 }
  0x17   :  { %p3564_p10 = pnand %p3562_p9, %p3559_p8 }
  0x19   :  { %3567 = shalt.err (!%p3564_p10)
}
  0x1a   :  { %s3568_s16 = scalar_lea.vmem %s19_s8, 2048  ;;  %p3573_p12 = scmp.lt.s32.totalorder %s19_s8, %s19_s8 }
  0x1b   :  { %p3569_p11 = scmp.ne.s32.totalorder %s19_s8, %s3568_s16  ;;  %p3574_p13 = scmp.lt.s32.totalorder %s3568_s16, %s3568_s16 }
  0x1d   :  { %p3575_p0 = por %p3574_p13, %p3573_p12 }
  0x1f   :  { %p3576_p1 = pnand %p3575_p0, %p3569_p11 }
  0x21   :  { %3579 = shalt.err (!%p3576_p1)
}
  0x22   :  { %s3634_s1 = smov 128   ;;  %s3635_s17 = smov 8  }
  0x23   :  { %24 = dma.hbm_to_vmem [thread:$0]  %s4738_s0, 2048, %s19_s8, [#allocation4], %s3634_s1, %s3634_s1, %s3635_s17  }
  0x24   :  { %s3636_s20 = smov [#allocation8]   ;;  %s3580_s24 = scalar_lea.hbm %s4740_s2, 6144 }
  0x25   :  { %s42_s21 = sshll.u32 %s3636_s20, 4  ;;  %p3581_p2 = scmp.ne.s32.totalorder %s4740_s2, %s3580_s24  ;;  %s43_s21 = int_to_ptr.vmem [resolvable:$true] %s42_s21 }
  0x26   :  { %p3584_p3 = scmp.lt.u32.totalorder %s3580_s24, %s4740_s2 }
  0x28   :  { %p3586_p4 = pnand %p3584_p3, %p3581_p2 }
  0x2a   :  { %3589 = shalt.err (!%p3586_p4)
}
  0x2b   :  { %s3590_s6 = scalar_lea.vmem %s43_s21, 6144  ;;  %p3595_p6 = scmp.lt.s32.totalorder %s43_s21, %s43_s21 }
  0x2c   :  { %p3591_p5 = scmp.ne.s32.totalorder %s43_s21, %s3590_s6  ;;  %p3596_p7 = scmp.lt.s32.totalorder %s3590_s6, %s3590_s6 }
  0x2e   :  { %p3597_p8 = por %p3596_p7, %p3595_p6 }
  0x30   :  { %p3598_p9 = pnand %p3597_p8, %p3591_p5 }
  0x32   :  { %3601 = shalt.err (!%p3598_p9)
}
  0x33   :  { %48 = dma.hbm_to_vmem [thread:$0]  %s4740_s2, 6144, %s43_s21, [#allocation7], %s3631_s28, %s3631_s28, %s3632_s29  }
  0x34   :  { %3624 = dma.done.wait [#allocation4], 2048  }
  0x35   :  { %3625 = vsyncadd [#allocation4], 4294965248 }
  0x36   :  { %3626 = dma.done.wait [#allocation7], 6912  }
  0x37   :  { %3627 = vsyncadd [#allocation7], 4294960384  ;;  %v4744_v0 = vmov 0.0   ;;  %v79_v1 = vld [vmem:[#allocation6 + $0x8] sm:$0xff]  ;;  %v82_v2 = vld [vmem:[#allocation6 + $0x20] sm:$0xff]  ;;  %vm101_vm0 = vcmask 130048  }
  0x38   :  { %214 = vmatprep.mubr.f32.mxu0 %v4744_v0  ;;  %292 = vmatprep.mubr.f32.mxu1 %v4744_v0  ;;  %v78_v3 = vld [vmem:[#allocation6] sm:$0xff]  ;;  %v2844_v4 = vpack.c.bf16 %v82_v2, %v79_v1  ;;  %v81_v5 = vld [vmem:[#allocation6 + $0x18] sm:$0xff]  ;;  %v80_v7 = vld [vmem:[#allocation6 + $0x10] sm:$0xff] }
  0x39   :  { %v2846_v6 = vpack.c.bf16 %v81_v5, %v78_v3  ;;  %v83_v8 = vld [vmem:[#allocation6 + $0x28] sm:$0xff]  ;;  %v62_v9 = vld [vmem:[#allocation3] sm:$0xff]  ;;  %v505_v12 = vld [vmem:[#allocation8 + $0x8] sm:$0xff] }
  0x3a   :  { %2845 = vmatprep.subr.bf16.mxu0 %v2844_v4  ;;  %3364 = vmatprep.subr.bf16.mxu1 %v2844_v4  ;;  %v2848_v10 = vpack.c.bf16 %v83_v8, %v80_v7  ;;  %v3716_v11 = vld [vmem:[#allocation3 + $0x68] sm:$0xff]  ;;  %v508_v13 = vld [vmem:[#allocation8 + $0x20] sm:$0xff]  ;;  %v506_v15 = vld [vmem:[#allocation8 + $0x10] sm:$0xff] }
  0x3b   :  { %2847 = vmatpush1.bf16.msra.mxu0 %v2846_v6  ;;  %3365 = vmatpush1.bf16.msra.mxu1 %v2846_v6  ;;  %v3718_v14 = vpack.c.bf16 %v508_v13, %v505_v12  ;;  %v509_v16 = vld [vmem:[#allocation8 + $0x28] sm:$0xff]  ;;  %v63_v17 = vld [vmem:[#allocation3 + $0x8] sm:$0xff]  ;;  %v3724_v18 = vld [vmem:[#allocation3 + $0x70] sm:$0xff] }
  0x3c   :  { %2849 = vmatprep.subr.bf16.mxu1 %v2848_v10  ;;  %v3726_v19 = vpack.c.bf16 %v509_v16, %v506_v15  ;;  %v512_v20 = vld [vmem:[#allocation8 + $0x40] sm:$0xff]  ;;  %v515_v21 = vld [vmem:[#allocation8 + $0x58] sm:$0xff]  ;;  %v3736_v23 = vld [vmem:[#allocation3 + $0x78] sm:$0xff] }
  0x3d   :  { %4790 = vst [vmem:[#allocation13_spill] sm:$0xff] %v3718_v14  ;;  %v64_v22 = vld [vmem:[#allocation3 + $0x10] sm:$0xff]  ;;  %v3738_v24 = vpack.c.bf16 %v515_v21, %v512_v20  ;;  %v507_v26 = vld [vmem:[#allocation8 + $0x18] sm:$0xff]  ;;  %v514_v28 = vld [vmem:[#allocation8 + $0x50] sm:$0xff] }
  0x3e   :  { %2309 = vmatmul.mubr.msk.f32.vlgmr.msra.gmra.mrb[0].mxu0 %vm101_vm0, %v62_v9  ;;  %2322 = vmatmul.mubr.msk.f32.vlgmr.msra.gmra.mrb[0].mxu1 %vm101_vm0, %v3716_v11  ;;  %v504_v25 = vld [vmem:[#allocation8] sm:$0xff]  ;;  %v511_v27 = vld [vmem:[#allocation8 + $0x38] sm:$0xff]  ;;  %v518_v29 = vld [vmem:[#allocation8 + $0x70] sm:$0xff] }
  0x3f   :  { %2851 = vmatpush3.bf16.msra.mxu1 %v2848_v10  ;;  %220 = vmatprep.mubr.f32.mxu0 %v4744_v0  ;;  %v521_v30 = vld [vmem:[#allocation8 + $0x88] sm:$0xff]  ;;  %v3749_v33 = vpack.c.bf16 %v507_v26, %v504_v25  ;;  %v3751_v34 = vpack.c.bf16 %v514_v28, %v511_v27  ;;  %v510_v35 = vld [vmem:[#allocation8 + $0x30] sm:$0xff]  ;;  %v520_v38 = vld [vmem:[#allocation8 + $0x80] sm:$0xff] }
  0x40   :  { %298 = vmatprep.mubr.f32.mxu1 %v4744_v0  ;;  %2853 = vmatprep.subr.bf16.mxu1 %v3718_v14  ;;  %v3745_v31 = vpack.c.bf16 %v521_v30, %v518_v29  ;;  %v65_v32 = vld [vmem:[#allocation3 + $0x18] sm:$0xff]  ;;  %v524_v39 = vld [vmem:[#allocation8 + $0xa0] sm:$0xff]  ;;  %v527_v40 = vld [vmem:[#allocation8 + $0xb8] sm:$0xff] }
  0x41   :  { %2885 = vmatprep.subr.bf16.mxu0 %v3726_v19  ;;  %v513_v36 = vld [vmem:[#allocation8 + $0x48] sm:$0xff]  ;;  %v66_v41 = vld [vmem:[#allocation3 + $0x20] sm:$0xff]  ;;  %v516_v44 = vld [vmem:[#allocation8 + $0x60] sm:$0xff]  ;;  %v3766_v48 = vpack.c.bf16 %v527_v40, %v524_v39 }
  0x42   :  { %2310 = vmatmul.mubr.msk.f32.gmra.mrb[2].mxu0 %vm101_vm0, %v63_v17  ;;  %2323 = vmatmul.mubr.msk.f32.gmra.mrb[2].mxu1 %vm101_vm0, %v3724_v18  ;;  %v517_v37 = vld [vmem:[#allocation8 + $0x68] sm:$0xff]  ;;  %v3759_v42 = vpack.c.bf16 %v513_v36, %v510_v35  ;;  %v519_v45 = vld [vmem:[#allocation8 + $0x78] sm:$0xff]  ;;  %v526_v47 = vld [vmem:[#allocation8 + $0xb0] sm:$0xff] }
  0x43   :  { %226 = vmatprep.mubr.f32.mxu0 %v4744_v0  ;;  %304 = vmatprep.mubr.f32.mxu1 %v4744_v0  ;;  %v3763_v43 = vpack.c.bf16 %v520_v38, %v517_v37  ;;  %v523_v46 = vld [vmem:[#allocation8 + $0x98] sm:$0xff]  ;;  %v3772_v50 = vpack.c.bf16 %v519_v45, %v516_v44  ;;  %v522_v52 = vld [vmem:[#allocation8 + $0x90] sm:$0xff]  ;;  %v525_v53 = vld [vmem:[#allocation8 + $0xa8] sm:$0xff] }
  0x44   :  { %2887 = vmatpush3.bf16.msra.mxu0 %v3726_v19  ;;  %v67_v49 = vld [vmem:[#allocation3 + $0x28] sm:$0xff]  ;;  %v3776_v51 = vpack.c.bf16 %v526_v47, %v523_v46  ;;  %v68_v54 = vld [vmem:[#allocation3 + $0x30] sm:$0xff]  ;;  %v529_v55 = vld [vmem:[#allocation8 + $0xc8] sm:$0xff]  ;;  %v3783_v60 = vpack.c.bf16 %v525_v53, %v522_v52 }
  0x45   :  { %2889 = vmatprep.subr.bf16.mxu0 %v3738_v24  ;;  %v532_v56 = vld [vmem:[#allocation8 + $0xe0] sm:$0xff]  ;;  %v530_v57 = vld [vmem:[#allocation8 + $0xd0] sm:$0xff]  ;;  %v533_v58 = vld [vmem:[#allocation8 + $0xe8] sm:$0xff] }
  0x46   :  { %2311 = vmatmul.mubr.msk.f32.gmra.mrb[4].mxu0 %vm101_vm0, %v64_v22  ;;  %2324 = vmatmul.mubr.msk.f32.gmra.mrb[4].mxu1 %vm101_vm0, %v3736_v23  ;;  %v69_v59 = vld [vmem:[#allocation3 + $0x38] sm:$0xff]  ;;  %v3787_v61 = vpack.c.bf16 %v532_v56, %v529_v55  ;;  %v528_v62 = vld [vmem:[#allocation8 + $0xc0] sm:$0xff]  ;;  %v531_v63 = vld [vmem:[#allocation8 + $0xd8] sm:$0xff]  ;;  %v3790_v4 = vpack.c.bf16 %v533_v58, %v530_v57 }
  0x47   :  { %232 = vmatprep.mubr.f32.mxu0 %v4744_v0  ;;  %2540 = vmatprep.mubr.msk.f32.mxu1 %vm101_vm0, %v62_v9  ;;  %v70_v1 = vld [vmem:[#allocation3 + $0x40] sm:$0xff]  ;;  %v535_v2 = vld [vmem:[#allocation8 + $0xf8] sm:$0xff]  ;;  %v3796_v6 = vpack.c.bf16 %v531_v63, %v528_v62  ;;  %v537_v9 = vld [vmem:[#allocation8 + $0x108] sm:$0xff] }
  0x48   :  { %2891 = vmatpush3.bf16.msra.mxu0 %v3738_v24  ;;  %v538_v3 = vld [vmem:[#allocation8 + $0x110] sm:$0xff]  ;;  %v71_v5 = vld [vmem:[#allocation3 + $0x48] sm:$0xff]  ;;  %v72_v10 = vld [vmem:[#allocation3 + $0x50] sm:$0xff] }
  0x49   :  { %2893 = vmatprep.subr.bf16.mxu0 %v3745_v31  ;;  %v3800_v7 = vpack.c.bf16 %v538_v3, %v535_v2  ;;  %v534_v8 = vld [vmem:[#allocation8 + $0xf0] sm:$0xff]  ;;  %v541_v12 = vld [vmem:[#allocation8 + $0x128] sm:$0xff]  ;;  %v544_v13 = vld [vmem:[#allocation8 + $0x140] sm:$0xff] }
  0x4a   :  { %2312 = vmatmul.mubr.msk.f32.gmra.mrb[6].mxu0 %vm101_vm0, %v65_v32  ;;  %2541 = vmatmul.mubr.msk.f32.vlgmr.msra.gmra.mrb[6].mxu1 %vm101_vm0, %v63_v17  ;;  %v536_v15 = vld [vmem:[#allocation8 + $0x100] sm:$0xff]  ;;  %v539_v16 = vld [vmem:[#allocation8 + $0x118] sm:$0xff]  ;;  %v73_v17 = vld [vmem:[#allocation3 + $0x58] sm:$0xff]  ;;  %v3807_v20 = vpack.c.bf16 %v537_v9, %v534_v8  ;;  %v3811_v21 = vpack.c.bf16 %v544_v13, %v541_v12 }
  0x4b   :  { %2855 = vmatpush1.bf16.msra.mxu1 %v3749_v33  ;;  %238 = vmatprep.mubr.f32.mxu0 %v4744_v0  ;;  %v543_v25 = vld [vmem:[#allocation8 + $0x138] sm:$0xff]  ;;  %v74_v26 = vld [vmem:[#allocation3 + $0x60] sm:$0xff]  ;;  %v3814_v29 = vpack.c.bf16 %v539_v16, %v536_v15  ;;  %v549_v36 = vld [vmem:[#allocation8 + $0x168] sm:$0xff] }
  0x4c   :  { %2543 = vmatprep.mubr.msk.f32.mxu1 %vm101_vm0, %v64_v22  ;;  %2857 = vmatprep.subr.bf16.mxu1 %v3751_v34  ;;  %v540_v22 = vld [vmem:[#allocation8 + $0x120] sm:$0xff]  ;;  %v547_v27 = vld [vmem:[#allocation8 + $0x158] sm:$0xff]  ;;  %v550_v28 = vld [vmem:[#allocation8 + $0x170] sm:$0xff] }
  0x4d   :  { %2895 = vmatpush3.bf16.msra.mxu0 %v3745_v31  ;;  %v3820_v30 = vpack.c.bf16 %v543_v25, %v540_v22  ;;  %v546_v35 = vld [vmem:[#allocation8 + $0x150] sm:$0xff]  ;;  %v545_v38 = vld [vmem:[#allocation8 + $0x148] sm:$0xff]  ;;  %v551_v44 = vld [vmem:[#allocation8 + $0x178] sm:$0xff] }
  0x4e   :  { %2313 = vmatmul.mubr.msk.f32.gmra.mrb[8].mxu0 %vm101_vm0, %v66_v41  ;;  %2544 = vmatmul.mubr.msk.f32.gmra.mrb[8].mxu1 %vm101_vm0, %v65_v32  ;;  %v3824_v32 = vpack.c.bf16 %v550_v28, %v547_v27  ;;  %v542_v37 = vld [vmem:[#allocation8 + $0x130] sm:$0xff]  ;;  %v3832_v39 = vpack.c.bf16 %v549_v36, %v546_v35 }
  0x4f   :  { %2859 = vmatpush1.bf16.msra.mxu1 %v3759_v42  ;;  %244 = vmatprep.mubr.f32.mxu0 %v4744_v0  ;;  %v3837_v40 = vpack.c.bf16 %v545_v38, %v542_v37  ;;  %v84_v47 = vld [vmem:[%s4741_s3] sm:$0x7] }
  0x50   :  { %2546 = vmatprep.mubr.msk.f32.mxu1 %vm101_vm0, %v66_v41  ;;  %2861 = vmatprep.subr.bf16.mxu1 %v3763_v43  ;;  %v548_v41 = vld [vmem:[#allocation8 + $0x160] sm:$0xff] }
  0x51   :  { %2897 = vmatprep.subr.bf16.mxu0 %v3766_v48 }
  0x52   :  { %2314 = vmatmul.mubr.msk.f32.gmra.mrb[10].mxu0 %vm101_vm0, %v67_v49  ;;  %2547 = vmatmul.mubr.msk.f32.gmra.mrb[10].mxu1 %vm101_vm0, %v67_v49 }
  0x53   :  { %2863 = vmatpush1.bf16.msra.mxu1 %v3772_v50  ;;  %250 = vmatprep.mubr.f32.mxu0 %v4744_v0 }
  0x54   :  { %2549 = vmatprep.mubr.msk.f32.mxu1 %vm101_vm0, %v68_v54  ;;  %2865 = vmatprep.subr.bf16.mxu1 %v3776_v51 }
  0x55   :  { %2899 = vmatpush3.bf16.msra.mxu0 %v3766_v48 }
  0x56   :  { %2315 = vmatmul.mubr.msk.f32.gmra.mrb[12].mxu0 %vm101_vm0, %v68_v54  ;;  %2550 = vmatmul.mubr.msk.f32.gmra.mrb[12].mxu1 %vm101_vm0, %v69_v59 }
  0x57   :  { %2867 = vmatpush1.bf16.msra.mxu1 %v3783_v60  ;;  %256 = vmatprep.mubr.f32.mxu0 %v4744_v0 }
  0x58   :  { %2552 = vmatprep.mubr.msk.f32.mxu1 %vm101_vm0, %v70_v1  ;;  %2869 = vmatprep.subr.bf16.mxu1 %v3787_v61 }
  0x59   :  { %2901 = vmatprep.subr.bf16.mxu0 %v3790_v4 }
  0x5a   :  { %2316 = vmatmul.mubr.msk.f32.gmra.mrb[14].mxu0 %vm101_vm0, %v69_v59  ;;  %2553 = vmatmul.mubr.msk.f32.gmra.mrb[14].mxu1 %vm101_vm0, %v71_v5 }
  0x5b   :  { %2871 = vmatpush1.bf16.msra.mxu1 %v3796_v6  ;;  %262 = vmatprep.mubr.f32.mxu0 %v4744_v0 }
  0x5c   :  { %2555 = vmatprep.mubr.msk.f32.mxu1 %vm101_vm0, %v72_v10  ;;  %2873 = vmatprep.subr.bf16.mxu1 %v3800_v7 }
  0x5d   :  { %2903 = vmatpush3.bf16.msra.mxu0 %v3790_v4 }
  0x5e   :  { %2317 = vmatmul.mubr.msk.f32.gmra.mrb[16].mxu0 %vm101_vm0, %v70_v1  ;;  %2556 = vmatmul.mubr.msk.f32.gmra.mrb[16].mxu1 %vm101_vm0, %v73_v17 }
  0x5f   :  { %2875 = vmatpush1.bf16.msra.mxu1 %v3807_v20  ;;  %268 = vmatprep.mubr.f32.mxu0 %v4744_v0 }
  0x60   :  { %2558 = vmatprep.mubr.msk.f32.mxu1 %vm101_vm0, %v74_v26  ;;  %2877 = vmatprep.subr.bf16.mxu1 %v3811_v21 }
  0x61   :  { %2905 = vmatprep.subr.bf16.mxu0 %v3814_v29 }
  0x62   :  { %2318 = vmatmul.mubr.msk.f32.gmra.mrb[18].mxu0 %vm101_vm0, %v71_v5  ;;  %2559 = vmatmul.mubr.msk.f32.gmra.mrb[18].mxu1 %vm101_vm0, %v3716_v11  ;;  %v3847_v11 = vpack.c.bf16 %v551_v44, %v548_v41 }
  0x63   :  { %2879 = vmatpush1.bf16.msra.mxu1 %v3820_v30  ;;  %274 = vmatprep.mubr.f32.mxu0 %v4744_v0 }
  0x64   :  { %2561 = vmatprep.mubr.msk.f32.mxu1 %vm101_vm0, %v3724_v18  ;;  %2881 = vmatprep.subr.bf16.mxu1 %v3824_v32  ;;  %v86_v18 = vlaneseq }
  0x65   :  { %2907 = vmatpush3.bf16.msra.mxu0 %v3814_v29 }
  0x66   :  { %2319 = vmatmul.mubr.msk.f32.gmra.mrb[20].mxu0 %vm101_vm0, %v72_v10  ;;  %2562 = vmatmul.mubr.msk.f32.gmra.mrb[20].mxu1 %vm101_vm0, %v3736_v23  ;;  %v87_v23 = vshrl.u32 %v86_v18, 7  ;;  %v3895_v46 = vand.u32 127, %v86_v18 }
  0x67   :  { %2883 = vmatpush1.bf16.msra.mxu1 %v3832_v39  ;;  %280 = vmatprep.mubr.f32.mxu0 %v4744_v0 }
  0x68   :  { %679 = vmatprep.mubr.f32.mxu1 %v4744_v0  ;;  %2909 = vmatprep.subr.bf16.mxu0 %v3837_v40  ;;  %v88_v45 = vsub.s32 0, %v87_v23  ;;  %v92_v49 = vsub.s32 1, %v87_v23  ;;  %v555_v53 = vadd.s32 128, %v3895_v46  ;;  %vm593_vm1 = vcmp.lt.s32.totalorder %v3895_v46, 32 }
  0x69   :  { %2911 = vmatpush3.bf16.msra.mxu0 %v3837_v40  ;;  %2917 = vmatprep.subr.bf16.mxu1 %v3718_v14  ;;  %v96_v18 = vsub.s32 2, %v87_v23 }
  0x6a   :  { %2320 = vmatmul.mubr.msk.f32.gmra.mrb[22].mxu0 %vm101_vm0, %v73_v17  ;;  %680 = vmatmul.mubr.f32.vlgmr.msra.gmra.mrb[22].mxu1 %v4744_v0  ;;  %v3900_v52 = vrot.slane %v84_v47, %v88_v45  ;;  %v3903_v54 = vrot.slane %v84_v47, %v92_v49  ;;  %v568_v62 = vand.u32 127, %v555_v53 }
  0x6b   :  { %286 = vmatprep.mubr.f32.mxu0 %v4744_v0  ;;  %685 = vmatprep.mubr.f32.mxu1 %v4744_v0 }
  0x6c   :  { %2913 = vmatprep.subr.bf16.mxu0 %v3847_v11  ;;  %2919 = vmatpush1.bf16.msra.mxu1 %v3749_v33  ;;  %vm3915_vm2 = vcmp.lt.s32.totalorder %v568_v62, 32 }
  0x6d   :  { %2915 = vmatpush3.bf16.msra.mxu0 %v3847_v11  ;;  %2921 = vmatprep.subr.bf16.mxu1 %v3751_v34 }
  0x6e   :  { %2321 = vmatmul.mubr.msk.f32.gmra.mrb[24].mxu0 %vm101_vm0, %v74_v26  ;;  %686 = vmatmul.mubr.f32.gmra.mrb[24].mxu1 %v4744_v0 }
  0x6f   :  { %2596 = vmatprep.mubr.f32.mxu0 %v4744_v0  ;;  %2949 = vmatprep.subr.bf16.mxu0 %v3726_v19 }
  0x70   :  { %2923 = vmatpush1.bf16.msra.mxu1 %v3759_v42  ;;  %903 = vmatprep.mubr.f32.mxu1 %v4744_v0 }
  0x71   :  { %2925 = vmatprep.subr.bf16.mxu1 %v3763_v43 }
  0x72   :  { %2597 = vmatmul.mubr.f32.vlgmr.msra.gmra.mrb[26].mxu0 %v4744_v0 }
  0x73   :  { %2951 = vmatpush3.bf16.msra.mxu0 %v3726_v19 }
  0x74   :  { %2953 = vmatprep.subr.bf16.mxu0 %v3738_v24  ;;  %2927 = vmatpush1.bf16.msra.mxu1 %v3772_v50 }
  0x75   :  { %2929 = vmatprep.subr.bf16.mxu1 %v3776_v51 }
  0x77   :  { %2955 = vmatpush3.bf16.msra.mxu0 %v3738_v24 }
  0x78   :  { %2957 = vmatprep.subr.bf16.mxu0 %v3745_v31  ;;  %2931 = vmatpush1.bf16.msra.mxu1 %v3783_v60 }
  0x79   :  { %2933 = vmatprep.subr.bf16.mxu1 %v3787_v61 }
  0x7b   :  { %2959 = vmatpush3.bf16.msra.mxu0 %v3745_v31 }
  0x7c   :  { %2961 = vmatprep.subr.bf16.mxu0 %v3766_v48  ;;  %2935 = vmatpush1.bf16.msra.mxu1 %v3796_v6 }
  0x7d   :  { %2937 = vmatprep.subr.bf16.mxu1 %v3800_v7 }
  0x7f   :  { %2963 = vmatpush3.bf16.msra.mxu0 %v3766_v48 }
  0x80   :  { %2965 = vmatprep.subr.bf16.mxu0 %v3790_v4  ;;  %2939 = vmatpush1.bf16.msra.mxu1 %v3807_v20 }
  0x81   :  { %2941 = vmatprep.subr.bf16.mxu1 %v3811_v21 }
  0x83   :  { %2967 = vmatpush3.bf16.msra.mxu0 %v3790_v4 }
  0x84   :  { %2969 = vmatprep.subr.bf16.mxu0 %v3814_v29  ;;  %2943 = vmatpush1.bf16.msra.mxu1 %v3820_v30 }
  0x85   :  { %2945 = vmatprep.subr.bf16.mxu1 %v3824_v32 }
  0x87   :  { %2971 = vmatpush3.bf16.msra.mxu0 %v3814_v29 }
  0x88   :  { %2973 = vmatprep.subr.bf16.mxu0 %v3837_v40  ;;  %2947 = vmatpush1.bf16.msra.mxu1 %v3832_v39 }
  0x89   :  { %2981 = vmatprep.subr.bf16.mxu1 %v3718_v14 }
  0x8b   :  { %2975 = vmatpush3.bf16.msra.mxu0 %v3837_v40 }
  0x8c   :  { %2977 = vmatprep.subr.bf16.mxu0 %v3847_v11 }
  0x8f   :  { %2979 = vmatpush3.bf16.msra.mxu0 %v3847_v11 }
  0x90   :  { %3013 = vmatprep.subr.bf16.mxu0 %v3726_v19 }
 0x111   :  { %v294_v55 = vpop.f32.mrb[0].mxu1  ;;  %v216_v56 = vpop.f32.mrb[0].mxu0 }
 0x112   :  { %v295_v57 = vadd.f32 %v294_v55, %v3900_v52  ;;  %v296_v58 = vpop.f32.mrb[1].mxu1  ;;  %v218_v59 = vpop.f32.mrb[1].mxu0  ;;  %v217_v1 = vadd.f32 %v216_v56, %v3900_v52 }
 0x113   :  { %v3907_v63 = vadd.f32 %v296_v58, %v3903_v54  ;;  %v3911_v3 = vadd.f32 %v218_v59, %v3903_v54 }
 0x115   :  { %4791 = vst [vmem:[#allocation14_spill] sm:$0xff] %v3907_v63  ;;  %v300_v2 = vpop.f32.mrb[2].mxu1  ;;  %4792 = vst [vmem:[#allocation15_spill] sm:$0xff] %v3911_v3  ;;  %v222_v5 = vpop.f32.mrb[2].mxu0 }
 0x116   :  { %v301_v8 = vadd.f32 %v300_v2, %v3900_v52  ;;  %v302_v9 = vpop.f32.mrb[3].mxu1  ;;  %v224_v10 = vpop.f32.mrb[3].mxu0  ;;  %v223_v15 = vadd.f32 %v222_v5, %v3900_v52  ;;  %v3976_v2 = vrot.slane %v84_v47, %v96_v18 }
 0x117   :  { %v3920_v13 = vadd.f32 %v302_v9, %v3903_v54  ;;  %v3932_v25 = vadd.f32 %v224_v10, %v3903_v54 }
 0x118   :  { %v3925_v16 = vsel %vm593_vm1, %v217_v1, %v301_v8  ;;  %v3929_v17 = vsel %vm593_vm1, %v301_v8, %v217_v1 }
 0x119   :  { %4795 = vst [vmem:[#allocation16_spill] sm:$0xff] %v3920_v13  ;;  %4796 = vst [vmem:[#allocation17_spill] sm:$0xff] %v3929_v17  ;;  %v306_v22 = vpop.f32.mrb[4].mxu1  ;;  %v228_v26 = vpop.f32.mrb[4].mxu0 }
 0x11a   :  { %4797 = vst [vmem:[#allocation18_spill] sm:$0xff] %v3932_v25  ;;  %v307_v35 = vadd.f32 %v306_v22, %v3900_v52  ;;  %v308_v36 = vpop.f32.mrb[5].mxu1  ;;  %v3944_v37 = vadd.f32 %v228_v26, %v3900_v52  ;;  %v230_v38 = vpop.f32.mrb[5].mxu0 }
 0x11b   :  { %v3947_v41 = vadd.f32 %v308_v36, %v3903_v54  ;;  %v3950_v44 = vadd.f32 %v230_v38, %v3903_v54 }
 0x11c   :  { %v3954_v45 = vsel %vm593_vm1, %v223_v15, %v307_v35  ;;  %v3958_v49 = vsel %vm593_vm1, %v307_v35, %v223_v15 }
 0x11d   :  { %4798 = vst [vmem:[#allocation19_spill] sm:$0xff] %v3947_v41  ;;  %4799 = vst [vmem:[#allocation20_spill] sm:$0xff] %v3950_v44  ;;  %v234_v53 = vpop.f32.mrb[6].mxu0  ;;  %v3960_v55 = vpop.f32.mrb[6].mxu1 }
 0x11e   :  { %4800 = vst [vmem:[#allocation21_spill] sm:$0xff] %v3958_v49  ;;  %v235_v58 = vadd.f32 %v234_v53, %v3900_v52  ;;  %v236_v59 = vpop.f32.mrb[7].mxu0  ;;  %v3971_v62 = vpop.f32.mrb[7].mxu1  ;;  %v556_v53 = vadd.s32 256, %v3895_v46 }
 0x11f   :  { %v3974_v1 = vadd.f32 %v236_v59, %v3903_v54 }
 0x120   :  { %v3980_v5 = vsel %vm593_vm1, %v235_v58, %v295_v57  ;;  %v3984_v8 = vsel %vm593_vm1, %v295_v57, %v235_v58  ;;  %v575_v47 = vand.u32 127, %v556_v53 }
 0x121   :  { %4801 = vst [vmem:[#allocation22_spill] sm:$0xff] %v3974_v1  ;;  %4802 = vst [vmem:[#allocation23_spill] sm:$0xff] %v3980_v5  ;;  %v2545_v9 = vpop.f32.mrb[8].mxu1  ;;  %v240_v10 = vpop.f32.mrb[8].mxu0 }
 0x122   :  { %4803 = vst [vmem:[#allocation24_spill] sm:$0xff] %v3984_v8  ;;  %v3995_v22 = vadd.f32 %v2545_v9, %v3976_v2  ;;  %v387_v26 = vpop.f32.mrb[9].mxu1  ;;  %v3998_v35 = vadd.f32 %v240_v10, %v3900_v52  ;;  %v242_v57 = vpop.f32.mrb[9].mxu0  ;;  %vm4029_vm3 = vcmp.lt.s32.totalorder %v575_v47, 32 }
 0x123   :  { %v4001_v36 = vadd.f32 %v387_v26, %v3976_v2  ;;  %v4004_v38 = vadd.f32 %v242_v57, %v3903_v54 }
 0x124   :  { %4804 = vst [vmem:[#allocation25_spill] sm:$0xff] %v3995_v22 }
 0x125   :  { %4805 = vst [vmem:[#allocation26_spill] sm:$0xff] %v4001_v36  ;;  %v2548_v18 = vpop.f32.mrb[10].mxu1  ;;  %v246_v58 = vpop.f32.mrb[10].mxu0 }
 0x126   :  { %v4008_v59 = vadd.f32 %v2548_v18, %v3976_v2  ;;  %v397_v9 = vpop.f32.mrb[11].mxu1  ;;  %v4011_v23 = vadd.f32 %v246_v58, %v3900_v52  ;;  %v248_v10 = vpop.f32.mrb[11].mxu0 }
 0x127   :  { %v4014_v28 = vadd.f32 %v397_v9, %v3976_v2  ;;  %v4017_v26 = vadd.f32 %v248_v10, %v3903_v54 }
 0x129   :  { %v2551_v57 = vpop.f32.mrb[12].mxu1  ;;  %v252_v15 = vpop.f32.mrb[12].mxu0 }
 0x12a   :  { %v4020_v0 = vadd.f32 %v2551_v57, %v3976_v2  ;;  %v407_v56 = vpop.f32.mrb[13].mxu1  ;;  %v253_v18 = vadd.f32 %v252_v15, %v3900_v52  ;;  %v254_v27 = vpop.f32.mrb[13].mxu0 }
 0x12b   :  { %v4024_v58 = vadd.f32 %v407_v56, %v3976_v2  ;;  %v4027_v49 = vadd.f32 %v254_v27, %v3903_v54 }
 0x12c   :  { %4806 = vst [vmem:[#allocation27_spill] sm:$0xff] %v4020_v0 }
 0x12d   :  { %4807 = vst [vmem:[#allocation28_spill] sm:$0xff] %v4024_v58  ;;  %4808 = vst [vmem:[#allocation29_spill] sm:$0xff] %v4027_v49  ;;  %v2554_v9 = vpop.f32.mrb[14].mxu1  ;;  %v258_v53 = vpop.f32.mrb[14].mxu0  ;;  %v4153_v49 = vadd.f32 %v3971_v62, %v3976_v2 }
 0x12e   :  { %v4034_v17 = vadd.f32 %v2554_v9, %v3976_v2  ;;  %v417_v57 = vpop.f32.mrb[15].mxu1  ;;  %v259_v8 = vadd.f32 %v258_v53, %v3900_v52  ;;  %v260_v15 = vpop.f32.mrb[15].mxu0 }
 0x12f   :  { %v4038_v63 = vadd.f32 %v417_v57, %v3976_v2  ;;  %v4041_v56 = vadd.f32 %v260_v15, %v3903_v54  ;;  %4825 = vst [vmem:[#allocation44_spill] sm:$0xff] %v4153_v49 }
 0x130   :  { %4811 = vst [vmem:[#allocation30_spill] sm:$0xff] %v4034_v17 }
 0x131   :  { %4812 = vst [vmem:[#allocation31_spill] sm:$0xff] %v4038_v63  ;;  %4813 = vst [vmem:[#allocation32_spill] sm:$0xff] %v4041_v56  ;;  %v2557_v57 = vpop.f32.mrb[16].mxu1  ;;  %v264_v15 = vpop.f32.mrb[16].mxu0 }
 0x132   :  { %v4060_v1 = vadd.f32 %v2557_v57, %v3976_v2  ;;  %v427_v27 = vpop.f32.mrb[17].mxu1  ;;  %v265_v5 = vadd.f32 %v264_v15, %v3900_v52  ;;  %v266_v14 = vpop.f32.mrb[17].mxu0 }
 0x133   :  { %v4064_v47 = vadd.f32 %v427_v27, %v3976_v2  ;;  %v4067_v17 = vadd.f32 %v266_v14, %v3903_v54 }
 0x134   :  { %4814 = vst [vmem:[#allocation33_spill] sm:$0xff] %v4060_v1  ;;  %v4079_v15 = vsel %vm593_vm1, %v253_v18, %v265_v5  ;;  %v4083_v27 = vsel %vm593_vm1, %v265_v5, %v253_v18 }
 0x135   :  { %4815 = vst [vmem:[#allocation34_spill] sm:$0xff] %v4067_v17  ;;  %4816 = vst [vmem:[#allocation35_spill] sm:$0xff] %v4079_v15  ;;  %v2560_v53 = vpop.f32.mrb[18].mxu1  ;;  %v270_v57 = vpop.f32.mrb[18].mxu0 }
 0x136   :  { %4817 = vst [vmem:[#allocation36_spill] sm:$0xff] %v4083_v27  ;;  %v4102_v18 = vadd.f32 %v2560_v53, %v3976_v2  ;;  %v437_v14 = vpop.f32.mrb[19].mxu1  ;;  %v271_v27 = vadd.f32 %v270_v57, %v3900_v52  ;;  %v272_v63 = vpop.f32.mrb[19].mxu0 }
 0x137   :  { %v4106_v9 = vadd.f32 %v437_v14, %v3976_v2  ;;  %v4109_v58 = vadd.f32 %v272_v63, %v3903_v54 }
 0x138   :  { %4818 = vst [vmem:[#allocation37_spill] sm:$0xff] %v4102_v18  ;;  %v4121_v57 = vsel %vm593_vm1, %v259_v8, %v271_v27  ;;  %v4125_v14 = vsel %vm593_vm1, %v271_v27, %v259_v8  ;;  %v4145_v27 = vadd.f32 %v3960_v55, %v3976_v2 }
 0x139   :  { %4819 = vst [vmem:[#allocation38_spill] sm:$0xff] %v4106_v9  ;;  %4820 = vst [vmem:[#allocation39_spill] sm:$0xff] %v4109_v58  ;;  %v276_v0 = vpop.f32.mrb[20].mxu0  ;;  %v2563_v53 = vpop.f32.mrb[20].mxu1 }
 0x13a   :  { %4821 = vst [vmem:[#allocation40_spill] sm:$0xff] %v4121_v57  ;;  %4822 = vst [vmem:[#allocation41_spill] sm:$0xff] %v4125_v14  ;;  %v277_v63 = vadd.f32 %v276_v0, %v3900_v52  ;;  %v4149_v5 = vadd.f32 %v2563_v53, %v3976_v2  ;;  %v278_v14 = vpop.f32.mrb[21].mxu0  ;;  %v447_v17 = vpop.f32.mrb[21].mxu1 }
 0x13b   :  { %4823 = vst [vmem:[#allocation42_spill] sm:$0xff] %v4145_v27  ;;  %v4156_v57 = vadd.f32 %v278_v14, %v3903_v54  ;;  %v4159_v8 = vadd.f32 %v447_v17, %v3976_v2 }
 0x13c   :  { %4824 = vst [vmem:[#allocation43_spill] sm:$0xff] %v4149_v5  ;;  %v4172_v62 = vsel %vm593_vm1, %v3998_v35, %v277_v63  ;;  %v4177_v17 = vsel %vm593_vm1, %v277_v63, %v3998_v35 }
 0x13d   :  { %4826 = vst [vmem:[#allocation45_spill] sm:$0xff] %v4159_v8  ;;  %4827 = vst [vmem:[#allocation46_spill] sm:$0xff] %v4177_v17  ;;  %v611_v2 = vsel %vm4029_vm3, %v4153_v49, %v4159_v8  ;;  %v282_v14 = vpop.f32.mrb[22].mxu0  ;;  %v681_v55 = vpop.f32.mrb[22].mxu1  ;;  %v4828_v49 = vsel %vm3915_vm2, %v3911_v3, %v3920_v13 }
 0x13e   :  { %v283_v63 = vadd.f32 %v282_v14, %v3900_v52  ;;  %v767_v17 = vadd.f32 %v681_v55, %v3925_v16  ;;  %v284_v58 = vpop.f32.mrb[23].mxu0  ;;  %v683_v56 = vpop.f32.mrb[23].mxu1  ;;  %v4831_v14 = vsel %vm3915_vm2, %v3932_v25, %v3947_v41 }
 0x13f   :  { %v4198_v53 = vadd.f32 %v284_v58, %v3903_v54  ;;  %v781_v0 = vadd.f32 %v683_v56, %v4828_v49 }
 0x140   :  { %v2341_v8 = vmul.f32 -1.442695, %v767_v17  ;;  %v4208_v35 = vsel %vm593_vm1, %v4011_v23, %v283_v63  ;;  %v4213_v16 = vsel %vm593_vm1, %v283_v63, %v4011_v23 }
 0x141   :  { %4829 = vst [vmem:[#allocation47_spill] sm:$0xff] %v4213_v16  ;;  %v288_v55 = vpop.f32.mrb[24].mxu0  ;;  %v687_v58 = vpop.f32.mrb[24].mxu1 }
 0x142   :  { %3375 = vpow2.f32 %v2341_v8  ;;  %v289_v56 = vadd.f32 %v288_v55, %v3900_v52  ;;  %v768_v17 = vadd.f32 %v687_v58, %v3954_v45  ;;  %v290_v3 = vpop.f32.mrb[25].mxu0  ;;  %v689_v23 = vpop.f32.mrb[25].mxu1  ;;  %v2343_v45 = vmul.f32 -1.442695, %v781_v0 }
 0x143   :  { %v4226_v63 = vadd.f32 %v290_v3, %v3903_v54  ;;  %v782_v13 = vadd.f32 %v689_v23, %v4831_v14  ;;  %v4254_v23 = vld [vmem:[%s4742_s4] ss:$0 sm:$0xff] }
 0x144   :  { %v2342_v16 = vmul.f32 -1.442695, %v768_v17  ;;  %v4236_v8 = vsel %vm593_vm1, %v3944_v37, %v289_v56  ;;  %v4241_v52 = vsel %vm593_vm1, %v289_v56, %v3944_v37 }
 0x145   :  { %4830 = vst [vmem:[#allocation48_spill] sm:$0xff] %v4226_v63  ;;  %4832 = vst [vmem:[#allocation49_spill] sm:$0xff] %v4241_v52  ;;  %v2598_v54 = vpop.f32.mrb[26].mxu0  ;;  %v2344_v14 = vmul.f32 -1.442695, %v782_v13 }
 0x146   :  { %3377 = vpow2.f32 %v2342_v16  ;;  %v758_v58 = vpop.f32.mrb[27].mxu0 }
 0x147   :  { %3379 = vpow2.f32 %v2343_v45  ;;  %v801_v16 = vadd.f32 %v4254_v23, %v758_v58 }
 0x148   :  { %3381 = vpow2.f32 %v2344_v14  ;;  %v802_v14 = vadd.f32 %v2598_v54, %v4254_v23 }
 0x14c   :  { %v3376_v17 = vpop.eup %3375 }
 0x14d   :  { %v775_v46 = vadd.f32 1.0, %v3376_v17 }
 0x14f   :  { %3383 = vrcp.f32 %v775_v46 }
 0x150   :  { %v3378_v37 = vpop.eup %3377 }
 0x151   :  { %v776_v0 = vadd.f32 1.0, %v3378_v37  ;;  %v3380_v56 = vpop.eup %3379 }
 0x152   :  { %v3382_v49 = vpop.eup %3381  ;;  %v789_v3 = vadd.f32 1.0, %v3380_v56 }
 0x153   :  { %3385 = vrcp.f32 %v776_v0  ;;  %v790_v13 = vadd.f32 1.0, %v3382_v49  ;;  %v4833_v0 = vsel %vm4029_vm3, %v4145_v27, %v4149_v5  ;;  %v4841_v27 = vld [vmem:[#allocation14_spill] sm:$0xff] }
 0x154   :  { %3387 = vrcp.f32 %v789_v3 }
 0x155   :  { %3389 = vrcp.f32 %v790_v13 }
 0x159   :  { %v3384_v55 = vpop.eup %3383 }
 0x15a   :  { %v803_v45 = vmul.f32 %v3384_v55, %v801_v16 }
 0x15c   :  { %v805_v17 = vadd.f32 %v803_v45, %v611_v2 }
 0x15d   :  { %v3386_v46 = vpop.eup %3385 }
 0x15e   :  { %v804_v37 = vmul.f32 %v3386_v46, %v802_v14  ;;  %3391 = vtanh.f32 %v805_v17  ;;  %v3388_v56 = vpop.eup %3387  ;;  %v4835_v14 = vmov 0.0  }
 0x15f   :  { %v3390_v58 = vpop.eup %3389  ;;  %v809_v41 = vsub.f32 1.0, %v3388_v56  ;;  %v813_v55 = vmul.f32 0.0, %v3388_v56 }
 0x160   :  { %v806_v25 = vadd.f32 %v804_v37, %v4833_v0  ;;  %v810_v2 = vsub.f32 1.0, %v3390_v58  ;;  %v814_v45 = vmul.f32 0.0, %v3390_v58  ;;  %v4838_v0 = vsel %vm3915_vm2, %v3950_v44, %v4226_v63 }
 0x162   :  { %3393 = vtanh.f32 %v806_v25 }
 0x168   :  { %v3392_v49 = vpop.eup %3391 }
 0x169   :  { %v811_v3 = vmul.f32 %v3392_v49, %v809_v41  ;;  %v4837_v41 = vld [vmem:[#allocation13_spill] sm:$0xff] }
 0x16b   :  { %v4263_v16 = vadd.f32 %v813_v55, %v811_v3  ;;  %v4839_v55 = vld [vmem:[#allocation23_spill] sm:$0xff] }
 0x16c   :  { %v3394_v54 = vpop.eup %3393 }
 0x16d   :  { %4834 = vst [vmem:[#allocation50_spill] sm:$0xff] %v4263_v16  ;;  %904 = vmatmul.mubr.f32.vlgmr.msra.gmra.mrb[26].mxu1 %v4263_v16  ;;  %2631 = vmatprep.mubr.f32.mxu0 %v4263_v16  ;;  %v812_v13 = vmul.f32 %v3394_v54, %v810_v2 }
 0x16e   :  { %909 = vmatprep.mubr.f32.mxu1 %v4835_v14  ;;  %2983 = vmatpush1.bf16.msra.mxu1 %v3749_v33 }
 0x16f   :  { %v4269_v25 = vadd.f32 %v814_v45, %v812_v13  ;;  %2985 = vmatprep.subr.bf16.mxu1 %v3751_v34  ;;  %v4840_v45 = vld [vmem:[#allocation22_spill] sm:$0xff] }
 0x171   :  { %4836 = vst [vmem:[#allocation51_spill] sm:$0xff] %v4269_v25  ;;  %910 = vmatmul.mubr.f32.gmra.mrb[28].mxu1 %v4269_v25  ;;  %2632 = vmatmul.mubr.f32.vlgmr.msra.gmra.mrb[28].mxu0 %v4269_v25 }
 0x172   :  { %2987 = vmatpush1.bf16.msra.mxu1 %v3759_v42  ;;  %3015 = vmatpush3.bf16.msra.mxu0 %v3726_v19 }
 0x173   :  { %2989 = vmatprep.subr.bf16.mxu1 %v3763_v43  ;;  %3017 = vmatprep.subr.bf16.mxu0 %v3738_v24 }
 0x174   :  { %1121 = vmatprep.mubr.f32.mxu1 %v4835_v14 }
 0x176   :  { %2991 = vmatpush1.bf16.msra.mxu1 %v3772_v50  ;;  %3019 = vmatpush3.bf16.msra.mxu0 %v3738_v24 }
 0x177   :  { %2993 = vmatprep.subr.bf16.mxu1 %v3776_v51  ;;  %3021 = vmatprep.subr.bf16.mxu0 %v3745_v31 }
 0x17a   :  { %2995 = vmatpush1.bf16.msra.mxu1 %v3783_v60  ;;  %3023 = vmatpush3.bf16.msra.mxu0 %v3745_v31 }
 0x17b   :  { %2997 = vmatprep.subr.bf16.mxu1 %v3787_v61  ;;  %3025 = vmatprep.subr.bf16.mxu0 %v3766_v48 }
 0x17e   :  { %2999 = vmatpush1.bf16.msra.mxu1 %v3796_v6  ;;  %3027 = vmatpush3.bf16.msra.mxu0 %v3766_v48 }
 0x17f   :  { %3001 = vmatprep.subr.bf16.mxu1 %v3800_v7  ;;  %3029 = vmatprep.subr.bf16.mxu0 %v3790_v4 }
 0x182   :  { %3003 = vmatpush1.bf16.msra.mxu1 %v3807_v20  ;;  %3031 = vmatpush3.bf16.msra.mxu0 %v3790_v4 }
 0x183   :  { %3005 = vmatprep.subr.bf16.mxu1 %v3811_v21  ;;  %3033 = vmatprep.subr.bf16.mxu0 %v3814_v29 }
 0x186   :  { %3007 = vmatpush1.bf16.msra.mxu1 %v3820_v30  ;;  %3035 = vmatpush3.bf16.msra.mxu0 %v3814_v29 }
 0x187   :  { %3009 = vmatprep.subr.bf16.mxu1 %v3824_v32  ;;  %3037 = vmatprep.subr.bf16.mxu0 %v3837_v40 }
 0x18a   :  { %3011 = vmatpush1.bf16.msra.mxu1 %v3832_v39  ;;  %3039 = vmatpush3.bf16.msra.mxu0 %v3837_v40 }
 0x18b   :  { %3041 = vmatprep.subr.bf16.mxu0 %v3847_v11  ;;  %3045 = vmatprep.subr.bf16.mxu1 %v4837_v41 }
 0x18e   :  { %3043 = vmatpush3.bf16.msra.mxu0 %v3847_v11 }
 0x18f   :  { %3077 = vmatprep.subr.bf16.mxu0 %v3726_v19 }
 0x240   :  { %v905_v17 = vpop.f32.mrb[26].mxu1 }
 0x241   :  { %v991_v46 = vadd.f32 %v905_v17, %v4236_v8  ;;  %v907_v37 = vpop.f32.mrb[27].mxu1  ;;  %v4842_v8 = vsel %vm3915_vm2, %v4840_v45, %v4841_v27 }
 0x242   :  { %v1005_v56 = vadd.f32 %v907_v37, %v4838_v0 }
 0x243   :  { %v2346_v58 = vmul.f32 -1.442695, %v991_v46 }
 0x244   :  { %v911_v49 = vpop.f32.mrb[28].mxu1  ;;  %v2633_v3 = vpop.f32.mrb[28].mxu0  ;;  %v2348_v52 = vmul.f32 -1.442695, %v1005_v56 }
 0x245   :  { %3395 = vpow2.f32 %v2346_v58  ;;  %v992_v2 = vadd.f32 %v911_v49, %v4839_v55  ;;  %v913_v54 = vpop.f32.mrb[29].mxu1  ;;  %v982_v13 = vpop.f32.mrb[29].mxu0 }
 0x246   :  { %v1006_v17 = vadd.f32 %v913_v54, %v4842_v8  ;;  %v1019_v63 = vadd.f32 %v4254_v23, %v982_v13  ;;  %v4844_v13 = vsel %vm4029_vm3, %v3995_v22, %v4102_v18 }
 0x247   :  { %v2347_v5 = vmul.f32 -1.442695, %v992_v2 }
 0x248   :  { %v2349_v15 = vmul.f32 -1.442695, %v1006_v17 }
 0x249   :  { %3397 = vpow2.f32 %v2347_v5  ;;  %v1020_v5 = vadd.f32 %v2633_v3, %v4254_v23 }
 0x24a   :  { %3399 = vpow2.f32 %v2348_v52 }
 0x24b   :  { %3401 = vpow2.f32 %v2349_v15  ;;  %v4843_v15 = vsel %vm4029_vm3, %v4001_v36, %v4106_v9 }
 0x24f   :  { %v3396_v37 = vpop.eup %3395 }
 0x250   :  { %v999_v46 = vadd.f32 1.0, %v3396_v37 }
 0x252   :  { %3403 = vrcp.f32 %v999_v46 }
 0x253   :  { %v3398_v0 = vpop.eup %3397 }
 0x254   :  { %v1000_v58 = vadd.f32 1.0, %v3398_v0  ;;  %v3400_v49 = vpop.eup %3399 }
 0x255   :  { %v3402_v55 = vpop.eup %3401  ;;  %v1013_v44 = vadd.f32 1.0, %v3400_v49 }
 0x256   :  { %3405 = vrcp.f32 %v1000_v58  ;;  %v1014_v45 = vadd.f32 1.0, %v3402_v55 }
 0x257   :  { %3407 = vrcp.f32 %v1013_v44 }
 0x258   :  { %3409 = vrcp.f32 %v1014_v45 }
 0x25c   :  { %v3404_v1 = vpop.eup %3403 }
 0x25d   :  { %v1021_v2 = vmul.f32 %v3404_v1, %v1019_v63 }
 0x25f   :  { %v1023_v52 = vadd.f32 %v1021_v2, %v4843_v15 }
 0x260   :  { %v3406_v56 = vpop.eup %3405 }
 0x261   :  { %v1022_v54 = vmul.f32 %v3406_v56, %v1020_v5  ;;  %3411 = vtanh.f32 %v1023_v52  ;;  %v3408_v44 = vpop.eup %3407  ;;  %v4847_v52 = vsel %vm3915_vm2, %v4004_v38, %v4156_v57 }
 0x262   :  { %v3410_v1 = vpop.eup %3409  ;;  %v1027_v63 = vsub.f32 1.0, %v3408_v44  ;;  %v1031_v37 = vmul.f32 %v3408_v44, %v4263_v16 }
 0x263   :  { %v1024_v8 = vadd.f32 %v1022_v54, %v4844_v13  ;;  %v1028_v0 = vsub.f32 1.0, %v3410_v1  ;;  %v1032_v49 = vmul.f32 %v3410_v1, %v4269_v25 }
 0x265   :  { %3413 = vtanh.f32 %v1024_v8 }
 0x26b   :  { %v3412_v3 = vpop.eup %3411 }
 0x26c   :  { %v1029_v17 = vmul.f32 %v3412_v3, %v1027_v63 }
 0x26e   :  { %v4330_v46 = vadd.f32 %v1031_v37, %v1029_v17 }
 0x26f   :  { %v3414_v45 = vpop.eup %3413 }
 0x270   :  { %4845 = vst [vmem:[#allocation13_spill] sm:$0xff] %v4330_v46  ;;  %1122 = vmatmul.mubr.f32.vlgmr.msra.gmra.mrb[30].mxu1 %v4330_v46  ;;  %2666 = vmatprep.mubr.f32.mxu0 %v4330_v46  ;;  %v1030_v58 = vmul.f32 %v3414_v45, %v1028_v0 }
 0x271   :  { %1127 = vmatprep.mubr.f32.mxu1 %v4835_v14  ;;  %3047 = vmatpush1.bf16.msra.mxu1 %v3749_v33 }
 0x272   :  { %v4337_v55 = vadd.f32 %v1032_v49, %v1030_v58  ;;  %3049 = vmatprep.subr.bf16.mxu1 %v3751_v34 }
 0x274   :  { %4846 = vst [vmem:[#allocation23_spill] sm:$0xff] %v4337_v55  ;;  %1128 = vmatmul.mubr.f32.gmra.mrb[32].mxu1 %v4337_v55  ;;  %2667 = vmatmul.mubr.f32.vlgmr.msra.gmra.mrb[30].mxu0 %v4337_v55 }
 0x275   :  { %3051 = vmatpush1.bf16.msra.mxu1 %v3759_v42  ;;  %3079 = vmatpush3.bf16.msra.mxu0 %v3726_v19 }
 0x276   :  { %3053 = vmatprep.subr.bf16.mxu1 %v3763_v43  ;;  %3081 = vmatprep.subr.bf16.mxu0 %v3738_v24 }
 0x277   :  { %1339 = vmatprep.mubr.f32.mxu1 %v4835_v14 }
 0x279   :  { %3055 = vmatpush1.bf16.msra.mxu1 %v3772_v50  ;;  %3083 = vmatpush3.bf16.msra.mxu0 %v3738_v24 }
 0x27a   :  { %3057 = vmatprep.subr.bf16.mxu1 %v3776_v51  ;;  %3085 = vmatprep.subr.bf16.mxu0 %v3745_v31 }
 0x27d   :  { %3059 = vmatpush1.bf16.msra.mxu1 %v3783_v60  ;;  %3087 = vmatpush3.bf16.msra.mxu0 %v3745_v31 }
 0x27e   :  { %3061 = vmatprep.subr.bf16.mxu1 %v3787_v61  ;;  %3089 = vmatprep.subr.bf16.mxu0 %v3766_v48 }
 0x281   :  { %3063 = vmatpush1.bf16.msra.mxu1 %v3796_v6  ;;  %3091 = vmatpush3.bf16.msra.mxu0 %v3766_v48 }
 0x282   :  { %3065 = vmatprep.subr.bf16.mxu1 %v3800_v7  ;;  %3093 = vmatprep.subr.bf16.mxu0 %v3790_v4 }
 0x285   :  { %3067 = vmatpush1.bf16.msra.mxu1 %v3807_v20  ;;  %3095 = vmatpush3.bf16.msra.mxu0 %v3790_v4 }
 0x286   :  { %3069 = vmatprep.subr.bf16.mxu1 %v3811_v21  ;;  %3097 = vmatprep.subr.bf16.mxu0 %v3814_v29 }
 0x289   :  { %3071 = vmatpush1.bf16.msra.mxu1 %v3820_v30  ;;  %3099 = vmatpush3.bf16.msra.mxu0 %v3814_v29 }
 0x28a   :  { %3073 = vmatprep.subr.bf16.mxu1 %v3824_v32  ;;  %3101 = vmatprep.subr.bf16.mxu0 %v3837_v40 }
 0x28d   :  { %3075 = vmatpush1.bf16.msra.mxu1 %v3832_v39  ;;  %3103 = vmatpush3.bf16.msra.mxu0 %v3837_v40 }
 0x28e   :  { %3105 = vmatprep.subr.bf16.mxu0 %v3847_v11  ;;  %3109 = vmatprep.subr.bf16.mxu1 %v4837_v41 }
 0x291   :  { %3107 = vmatpush3.bf16.msra.mxu0 %v3847_v11 }
 0x292   :  { %3141 = vmatprep.subr.bf16.mxu0 %v3726_v19 }
 0x343   :  { %v1123_v2 = vpop.f32.mrb[30].mxu1 }
 0x344   :  { %v1209_v5 = vadd.f32 %v1123_v2, %v4172_v62  ;;  %v1125_v15 = vpop.f32.mrb[31].mxu1  ;;  %v4848_v62 = vsel %vm3915_vm2, %v4017_v26, %v4198_v53 }
 0x345   :  { %v1223_v56 = vadd.f32 %v1125_v15, %v4847_v52 }
 0x346   :  { %v2350_v54 = vmul.f32 -1.442695, %v1209_v5 }
 0x347   :  { %v1129_v13 = vpop.f32.mrb[32].mxu1  ;;  %v2668_v8 = vpop.f32.mrb[30].mxu0  ;;  %v2352_v37 = vmul.f32 -1.442695, %v1223_v56 }
 0x348   :  { %3415 = vpow2.f32 %v2350_v54  ;;  %v1210_v44 = vadd.f32 %v1129_v13, %v4208_v35  ;;  %v1131_v1 = vpop.f32.mrb[33].mxu1  ;;  %v1200_v63 = vpop.f32.mrb[31].mxu0  ;;  %v1238_v56 = vadd.f32 %v2668_v8, %v4254_v23 }
 0x349   :  { %v1224_v3 = vadd.f32 %v1131_v1, %v4848_v62  ;;  %v1237_v52 = vadd.f32 %v4254_v23, %v1200_v63  ;;  %v4849_v1 = vsel %vm4029_vm3, %v4014_v28, %v4064_v47  ;;  %v4850_v63 = vld [vmem:[#allocation33_spill] sm:$0xff] }
 0x34a   :  { %v2351_v17 = vmul.f32 -1.442695, %v1210_v44 }
 0x34b   :  { %v2353_v0 = vmul.f32 -1.442695, %v1224_v3 }
 0x34c   :  { %3417 = vpow2.f32 %v2351_v17 }
 0x34d   :  { %3419 = vpow2.f32 %v2352_v37  ;;  %v4851_v37 = vsel %vm4029_vm3, %v4008_v59, %v4850_v63 }
 0x34e   :  { %3421 = vpow2.f32 %v2353_v0 }
 0x352   :  { %v3416_v45 = vpop.eup %3415 }
 0x353   :  { %v1217_v58 = vadd.f32 1.0, %v3416_v45 }
 0x355   :  { %3423 = vrcp.f32 %v1217_v58 }
 0x356   :  { %v3418_v49 = vpop.eup %3417 }
 0x357   :  { %v1218_v2 = vadd.f32 1.0, %v3418_v49  ;;  %v3420_v35 = vpop.eup %3419 }
 0x358   :  { %v3422_v5 = vpop.eup %3421  ;;  %v1231_v15 = vadd.f32 1.0, %v3420_v35 }
 0x359   :  { %3425 = vrcp.f32 %v1218_v2  ;;  %v1232_v13 = vadd.f32 1.0, %v3422_v5 }
 0x35a   :  { %3427 = vrcp.f32 %v1231_v15 }
 0x35b   :  { %3429 = vrcp.f32 %v1232_v13 }
 0x35f   :  { %v3424_v54 = vpop.eup %3423 }
 0x360   :  { %v1239_v44 = vmul.f32 %v3424_v54, %v1237_v52 }
 0x362   :  { %v1241_v62 = vadd.f32 %v1239_v44, %v4849_v1  ;;  %v4854_v1 = vld [vmem:[#allocation35_spill] sm:$0xff] }
 0x363   :  { %v3426_v3 = vpop.eup %3425 }
 0x364   :  { %v1240_v17 = vmul.f32 %v3426_v3, %v1238_v56  ;;  %3431 = vtanh.f32 %v1241_v62  ;;  %v3428_v45 = vpop.eup %3427 }
 0x365   :  { %v3430_v58 = vpop.eup %3429  ;;  %v1245_v8 = vsub.f32 1.0, %v3428_v45  ;;  %v1249_v35 = vmul.f32 %v3428_v45, %v4330_v46 }
 0x366   :  { %v1242_v0 = vadd.f32 %v1240_v17, %v4851_v37  ;;  %v1246_v15 = vsub.f32 1.0, %v3430_v58  ;;  %v1250_v13 = vmul.f32 %v3430_v58, %v4337_v55  ;;  %v4855_v17 = vld [vmem:[#allocation29_spill] sm:$0xff]  ;;  %v4856_v37 = vld [vmem:[#allocation34_spill] sm:$0xff] }
 0x368   :  { %3433 = vtanh.f32 %v1242_v0  ;;  %v4857_v0 = vsel %vm3915_vm2, %v4855_v17, %v4856_v37 }
 0x36e   :  { %v3432_v49 = vpop.eup %3431 }
 0x36f   :  { %v1247_v2 = vmul.f32 %v3432_v49, %v1245_v8 }
 0x371   :  { %v4398_v5 = vadd.f32 %v1249_v35, %v1247_v2  ;;  %v4858_v2 = vld [vmem:[#allocation40_spill] sm:$0xff] }
 0x372   :  { %v3434_v52 = vpop.eup %3433 }
 0x373   :  { %4852 = vst [vmem:[#allocation14_spill] sm:$0xff] %v4398_v5  ;;  %1340 = vmatmul.mubr.f32.vlgmr.msra.gmra.mrb[34].mxu1 %v4398_v5  ;;  %2701 = vmatprep.mubr.f32.mxu0 %v4398_v5  ;;  %v1248_v54 = vmul.f32 %v3434_v52, %v1246_v15 }
 0x374   :  { %1345 = vmatprep.mubr.f32.mxu1 %v4835_v14  ;;  %3111 = vmatpush1.bf16.msra.mxu1 %v3749_v33 }
 0x375   :  { %v4405_v44 = vadd.f32 %v1250_v13, %v1248_v54  ;;  %3113 = vmatprep.subr.bf16.mxu1 %v3751_v34  ;;  %v4859_v54 = vld [vmem:[#allocation32_spill] sm:$0xff]  ;;  %v4860_v13 = vld [vmem:[#allocation39_spill] sm:$0xff] }
 0x377   :  { %4853 = vst [vmem:[#allocation33_spill] sm:$0xff] %v4405_v44  ;;  %1346 = vmatmul.mubr.f32.gmra.mrb[36].mxu1 %v4405_v44  ;;  %2702 = vmatmul.mubr.f32.vlgmr.msra.gmra.mrb[32].mxu0 %v4405_v44 }
 0x378   :  { %3115 = vmatpush1.bf16.msra.mxu1 %v3759_v42  ;;  %3143 = vmatpush3.bf16.msra.mxu0 %v3726_v19 }
 0x379   :  { %3117 = vmatprep.subr.bf16.mxu1 %v3763_v43  ;;  %3145 = vmatprep.subr.bf16.mxu0 %v3738_v24 }
 0x37a   :  { %1543 = vmatprep.mubr.f32.mxu1 %v4835_v14 }
 0x37c   :  { %3119 = vmatpush1.bf16.msra.mxu1 %v3772_v50  ;;  %3147 = vmatpush3.bf16.msra.mxu0 %v3738_v24 }
 0x37d   :  { %3121 = vmatprep.subr.bf16.mxu1 %v3776_v51  ;;  %3149 = vmatprep.subr.bf16.mxu0 %v3745_v31 }
 0x380   :  { %3123 = vmatpush1.bf16.msra.mxu1 %v3783_v60  ;;  %3151 = vmatpush3.bf16.msra.mxu0 %v3745_v31 }
 0x381   :  { %3125 = vmatprep.subr.bf16.mxu1 %v3787_v61  ;;  %3153 = vmatprep.subr.bf16.mxu0 %v3766_v48 }
 0x384   :  { %3127 = vmatpush1.bf16.msra.mxu1 %v3796_v6  ;;  %3155 = vmatpush3.bf16.msra.mxu0 %v3766_v48 }
 0x385   :  { %3129 = vmatprep.subr.bf16.mxu1 %v3800_v7  ;;  %3157 = vmatprep.subr.bf16.mxu0 %v3790_v4 }
 0x388   :  { %3131 = vmatpush1.bf16.msra.mxu1 %v3807_v20  ;;  %3159 = vmatpush3.bf16.msra.mxu0 %v3790_v4 }
 0x389   :  { %3133 = vmatprep.subr.bf16.mxu1 %v3811_v21  ;;  %3161 = vmatprep.subr.bf16.mxu0 %v3814_v29 }
 0x38c   :  { %3135 = vmatpush1.bf16.msra.mxu1 %v3820_v30  ;;  %3163 = vmatpush3.bf16.msra.mxu0 %v3814_v29 }
 0x38d   :  { %3137 = vmatprep.subr.bf16.mxu1 %v3824_v32  ;;  %3165 = vmatprep.subr.bf16.mxu0 %v3837_v40 }
 0x390   :  { %3139 = vmatpush1.bf16.msra.mxu1 %v3832_v39  ;;  %3167 = vmatpush3.bf16.msra.mxu0 %v3837_v40 }
 0x391   :  { %3169 = vmatprep.subr.bf16.mxu0 %v3847_v11  ;;  %3173 = vmatprep.subr.bf16.mxu1 %v4837_v41 }
 0x394   :  { %3171 = vmatpush3.bf16.msra.mxu0 %v3847_v11 }
 0x395   :  { %3205 = vmatprep.subr.bf16.mxu0 %v3726_v19 }
 0x446   :  { %v1341_v56 = vpop.f32.mrb[34].mxu1 }
 0x447   :  { %v1427_v62 = vadd.f32 %v1341_v56, %v4854_v1  ;;  %v1343_v3 = vpop.f32.mrb[35].mxu1  ;;  %v4861_v56 = vsel %vm3915_vm2, %v4859_v54, %v4860_v13 }
 0x448   :  { %v1441_v45 = vadd.f32 %v1343_v3, %v4857_v0 }
 0x449   :  { %v2354_v58 = vmul.f32 -1.442695, %v1427_v62 }
 0x44a   :  { %v1347_v8 = vpop.f32.mrb[36].mxu1  ;;  %v2703_v49 = vpop.f32.mrb[32].mxu0  ;;  %v2356_v25 = vmul.f32 -1.442695, %v1441_v45 }
 0x44b   :  { %3435 = vpow2.f32 %v2354_v58  ;;  %v1428_v35 = vadd.f32 %v1347_v8, %v4858_v2  ;;  %v1349_v15 = vpop.f32.mrb[37].mxu1  ;;  %v1418_v52 = vpop.f32.mrb[33].mxu0 }
 0x44c   :  { %v1442_v1 = vadd.f32 %v1349_v15, %v4861_v56  ;;  %v1455_v22 = vadd.f32 %v4254_v23, %v1418_v52  ;;  %v4866_v52 = vld [vmem:[#allocation30_spill] sm:$0xff] }
 0x44d   :  { %v2355_v55 = vmul.f32 -1.442695, %v1428_v35 }
 0x44e   :  { %v2357_v46 = vmul.f32 -1.442695, %v1442_v1 }
 0x44f   :  { %3437 = vpow2.f32 %v2355_v55  ;;  %v1456_v55 = vadd.f32 %v2703_v49, %v4254_v23 }
 0x450   :  { %3439 = vpow2.f32 %v2356_v25  ;;  %v4862_v25 = vld [vmem:[#allocation28_spill] sm:$0xff] }
 0x451   :  { %3441 = vpow2.f32 %v2357_v46  ;;  %v4863_v46 = vld [vmem:[#allocation31_spill] sm:$0xff] }
 0x452   :  { %v4864_v45 = vsel %vm4029_vm3, %v4862_v25, %v4863_v46 }
 0x455   :  { %v3436_v3 = vpop.eup %3435 }
 0x456   :  { %v1435_v62 = vadd.f32 1.0, %v3436_v3  ;;  %v4865_v3 = vld [vmem:[#allocation27_spill] sm:$0xff] }
 0x458   :  { %3443 = vrcp.f32 %v1435_v62  ;;  %v4867_v62 = vsel %vm4029_vm3, %v4865_v3, %v4866_v52 }
 0x459   :  { %v3438_v0 = vpop.eup %3437 }
 0x45a   :  { %v1436_v58 = vadd.f32 1.0, %v3438_v0  ;;  %v3440_v8 = vpop.eup %3439 }
 0x45b   :  { %v3442_v2 = vpop.eup %3441  ;;  %v1449_v16 = vadd.f32 1.0, %v3440_v8 }
 0x45c   :  { %3445 = vrcp.f32 %v1436_v58  ;;  %v1450_v36 = vadd.f32 1.0, %v3442_v2 }
 0x45d   :  { %3447 = vrcp.f32 %v1449_v16 }
 0x45e   :  { %3449 = vrcp.f32 %v1450_v36 }
 0x462   :  { %v3444_v18 = vpop.eup %3443 }
 0x463   :  { %v1457_v35 = vmul.f32 %v3444_v18, %v1455_v22 }
 0x465   :  { %v1459_v15 = vadd.f32 %v1457_v35, %v4864_v45 }
 0x466   :  { %v3446_v56 = vpop.eup %3445 }
 0x467   :  { %v1458_v1 = vmul.f32 %v3446_v56, %v1456_v55  ;;  %3451 = vtanh.f32 %v1459_v15  ;;  %v3448_v22 = vpop.eup %3447 }
 0x468   :  { %v3450_v18 = vpop.eup %3449  ;;  %v1463_v16 = vsub.f32 1.0, %v3448_v22  ;;  %v1467_v8 = vmul.f32 %v3448_v22, %v4398_v5  ;;  %v4869_v22 = vsel %vm3915_vm2, %v4856_v37, %v4855_v17 }
 0x469   :  { %v1460_v0 = vadd.f32 %v1458_v1, %v4867_v62  ;;  %v1464_v35 = vsub.f32 1.0, %v3450_v18  ;;  %v1468_v45 = vmul.f32 %v3450_v18, %v4405_v44  ;;  %v4868_v1 = vld [vmem:[#allocation36_spill] sm:$0xff] }
 0x46b   :  { %3453 = vtanh.f32 %v1460_v0 }
 0x471   :  { %v3452_v49 = vpop.eup %3451 }
 0x472   :  { %v1465_v58 = vmul.f32 %v3452_v49, %v1463_v16 }
 0x474   :  { %v4466_v2 = vadd.f32 %v1467_v8, %v1465_v58  ;;  %v4870_v8 = vld [vmem:[#allocation41_spill] sm:$0xff] }
 0x475   :  { %v3454_v36 = vpop.eup %3453 }
 0x476   :  { %1544 = vmatmul.mubr.f32.vlgmr.msra.gmra.mrb[38].mxu1 %v4466_v2  ;;  %2736 = vmatprep.mubr.f32.mxu0 %v4466_v2  ;;  %v1466_v55 = vmul.f32 %v3454_v36, %v1464_v35 }
 0x477   :  { %1549 = vmatprep.mubr.f32.mxu1 %v4835_v14  ;;  %3175 = vmatpush1.bf16.msra.mxu1 %v3749_v33 }
 0x478   :  { %v4473_v15 = vadd.f32 %v1468_v45, %v1466_v55  ;;  %3177 = vmatprep.subr.bf16.mxu1 %v3751_v34  ;;  %v4871_v45 = vsel %vm3915_vm2, %v4860_v13, %v4859_v54 }
 0x47a   :  { %1550 = vmatmul.mubr.f32.gmra.mrb[40].mxu1 %v4473_v15  ;;  %2737 = vmatmul.mubr.f32.vlgmr.msra.gmra.mrb[34].mxu0 %v4473_v15 }
 0x47b   :  { %3179 = vmatpush1.bf16.msra.mxu1 %v3759_v42  ;;  %3207 = vmatpush3.bf16.msra.mxu0 %v3726_v19 }
 0x47c   :  { %3181 = vmatprep.subr.bf16.mxu1 %v3763_v43  ;;  %3209 = vmatprep.subr.bf16.mxu0 %v3738_v24 }
 0x47d   :  { %1747 = vmatprep.mubr.f32.mxu1 %v4835_v14 }
 0x47f   :  { %3183 = vmatpush1.bf16.msra.mxu1 %v3772_v50  ;;  %3211 = vmatpush3.bf16.msra.mxu0 %v3738_v24 }
 0x480   :  { %3185 = vmatprep.subr.bf16.mxu1 %v3776_v51  ;;  %3213 = vmatprep.subr.bf16.mxu0 %v3745_v31 }
 0x483   :  { %3187 = vmatpush1.bf16.msra.mxu1 %v3783_v60  ;;  %3215 = vmatpush3.bf16.msra.mxu0 %v3745_v31 }
 0x484   :  { %3189 = vmatprep.subr.bf16.mxu1 %v3787_v61  ;;  %3217 = vmatprep.subr.bf16.mxu0 %v3766_v48 }
 0x487   :  { %3191 = vmatpush1.bf16.msra.mxu1 %v3796_v6  ;;  %3219 = vmatpush3.bf16.msra.mxu0 %v3766_v48 }
 0x488   :  { %3193 = vmatprep.subr.bf16.mxu1 %v3800_v7  ;;  %3221 = vmatprep.subr.bf16.mxu0 %v3790_v4 }
 0x48b   :  { %3195 = vmatpush1.bf16.msra.mxu1 %v3807_v20  ;;  %3223 = vmatpush3.bf16.msra.mxu0 %v3790_v4 }
 0x48c   :  { %3197 = vmatprep.subr.bf16.mxu1 %v3811_v21  ;;  %3225 = vmatprep.subr.bf16.mxu0 %v3814_v29 }
 0x48f   :  { %3199 = vmatpush1.bf16.msra.mxu1 %v3820_v30  ;;  %3227 = vmatpush3.bf16.msra.mxu0 %v3814_v29 }
 0x490   :  { %3201 = vmatprep.subr.bf16.mxu1 %v3824_v32  ;;  %3229 = vmatprep.subr.bf16.mxu0 %v3837_v40 }
 0x493   :  { %3203 = vmatpush1.bf16.msra.mxu1 %v3832_v39  ;;  %3231 = vmatpush3.bf16.msra.mxu0 %v3837_v40 }
 0x494   :  { %3233 = vmatprep.subr.bf16.mxu0 %v3847_v11  ;;  %3237 = vmatprep.subr.bf16.mxu1 %v4837_v41 }
 0x497   :  { %3235 = vmatpush3.bf16.msra.mxu0 %v3847_v11 }
 0x498   :  { %3269 = vmatprep.subr.bf16.mxu0 %v3726_v19 }
 0x549   :  { %v1545_v56 = vpop.f32.mrb[38].mxu1 }
 0x54a   :  { %v1631_v62 = vadd.f32 %v1545_v56, %v4868_v1  ;;  %v1547_v0 = vpop.f32.mrb[39].mxu1 }
 0x54b   :  { %v1645_v18 = vadd.f32 %v1547_v0, %v4869_v22 }
 0x54c   :  { %v2358_v16 = vmul.f32 -1.442695, %v1631_v62 }
 0x54d   :  { %v1551_v49 = vpop.f32.mrb[40].mxu1  ;;  %v2738_v58 = vpop.f32.mrb[34].mxu0  ;;  %v2360_v44 = vmul.f32 -1.442695, %v1645_v18 }
 0x54e   :  { %3455 = vpow2.f32 %v2358_v16  ;;  %v1632_v35 = vadd.f32 %v1551_v49, %v4870_v8  ;;  %v1553_v36 = vpop.f32.mrb[41].mxu1  ;;  %v1622_v55 = vpop.f32.mrb[35].mxu0  ;;  %v1660_v18 = vadd.f32 %v2738_v58, %v4254_v23 }
 0x54f   :  { %v1646_v56 = vadd.f32 %v1553_v36, %v4871_v45  ;;  %v1659_v8 = vadd.f32 %v4254_v23, %v1622_v55  ;;  %v4873_v55 = vsel %vm4029_vm3, %v4866_v52, %v4865_v3 }
 0x550   :  { %v2359_v1 = vmul.f32 -1.442695, %v1632_v35 }
 0x551   :  { %v2361_v5 = vmul.f32 -1.442695, %v1646_v56 }
 0x552   :  { %3457 = vpow2.f32 %v2359_v1 }
 0x553   :  { %3459 = vpow2.f32 %v2360_v44 }
 0x554   :  { %3461 = vpow2.f32 %v2361_v5  ;;  %v4872_v5 = vsel %vm4029_vm3, %v4863_v46, %v4862_v25 }
 0x558   :  { %v3456_v17 = vpop.eup %3455 }
 0x559   :  { %v1639_v37 = vadd.f32 1.0, %v3456_v17 }
 0x55b   :  { %3463 = vrcp.f32 %v1639_v37 }
 0x55c   :  { %v3458_v62 = vpop.eup %3457 }
 0x55d   :  { %v1640_v0 = vadd.f32 1.0, %v3458_v62  ;;  %v3460_v22 = vpop.eup %3459 }
 0x55e   :  { %v3462_v16 = vpop.eup %3461  ;;  %v1653_v49 = vadd.f32 1.0, %v3460_v22 }
 0x55f   :  { %3465 = vrcp.f32 %v1640_v0  ;;  %v1654_v54 = vadd.f32 1.0, %v3462_v16  ;;  %v4874_v16 = vld [vmem:[#allocation46_spill] sm:$0xff] }
 0x560   :  { %3467 = vrcp.f32 %v1653_v49 }
 0x561   :  { %3469 = vrcp.f32 %v1654_v54  ;;  %v4875_v54 = vsel %vm3915_vm2, %v4156_v57, %v4004_v38 }
 0x565   :  { %v3464_v9 = vpop.eup %3463 }
 0x566   :  { %v1661_v13 = vmul.f32 %v3464_v9, %v1659_v8 }
 0x568   :  { %v1663_v44 = vadd.f32 %v1661_v13, %v4872_v5 }
 0x569   :  { %v3466_v35 = vpop.eup %3465 }
 0x56a   :  { %v1662_v36 = vmul.f32 %v3466_v35, %v1660_v18  ;;  %3471 = vtanh.f32 %v1663_v44  ;;  %v3468_v9 = vpop.eup %3467  ;;  %v4876_v35 = vld [vmem:[#allocation47_spill] sm:$0xff] }
 0x56b   :  { %v3470_v56 = vpop.eup %3469  ;;  %v1667_v58 = vsub.f32 1.0, %v3468_v9  ;;  %v1671_v37 = vmul.f32 %v3468_v9, %v4466_v2 }
 0x56c   :  { %v1664_v45 = vadd.f32 %v1662_v36, %v4873_v55  ;;  %v1668_v46 = vsub.f32 1.0, %v3470_v56  ;;  %v1672_v3 = vmul.f32 %v3470_v56, %v4473_v15 }
 0x56e   :  { %3473 = vtanh.f32 %v1664_v45  ;;  %v4877_v45 = vsel %vm3915_vm2, %v4198_v53, %v4017_v26 }
 0x574   :  { %v3472_v1 = vpop.eup %3471 }
 0x575   :  { %v1669_v17 = vmul.f32 %v3472_v1, %v1667_v58 }
 0x577   :  { %v4534_v25 = vadd.f32 %v1671_v37, %v1669_v17 }
 0x578   :  { %v3474_v62 = vpop.eup %3473 }
 0x579   :  { %1748 = vmatmul.mubr.f32.vlgmr.msra.gmra.mrb[42].mxu1 %v4534_v25  ;;  %2771 = vmatprep.mubr.f32.mxu0 %v4534_v25  ;;  %v1670_v0 = vmul.f32 %v3474_v62, %v1668_v46 }
 0x57a   :  { %1753 = vmatprep.mubr.f32.mxu1 %v4835_v14  ;;  %3239 = vmatpush1.bf16.msra.mxu1 %v3749_v33 }
 0x57b   :  { %v4541_v52 = vadd.f32 %v1672_v3, %v1670_v0  ;;  %3241 = vmatprep.subr.bf16.mxu1 %v3751_v34 }
 0x57d   :  { %1754 = vmatmul.mubr.f32.gmra.mrb[44].mxu1 %v4541_v52  ;;  %2772 = vmatmul.mubr.f32.vlgmr.msra.gmra.mrb[36].mxu0 %v4541_v52 }
 0x57e   :  { %3243 = vmatpush1.bf16.msra.mxu1 %v3759_v42  ;;  %3271 = vmatpush3.bf16.msra.mxu0 %v3726_v19 }
 0x57f   :  { %3245 = vmatprep.subr.bf16.mxu1 %v3763_v43  ;;  %3273 = vmatprep.subr.bf16.mxu0 %v3738_v24 }
 0x580   :  { %1951 = vmatprep.mubr.f32.mxu1 %v4835_v14 }
 0x582   :  { %3247 = vmatpush1.bf16.msra.mxu1 %v3772_v50  ;;  %3275 = vmatpush3.bf16.msra.mxu0 %v3738_v24 }
 0x583   :  { %3249 = vmatprep.subr.bf16.mxu1 %v3776_v51  ;;  %3277 = vmatprep.subr.bf16.mxu0 %v3745_v31 }
 0x586   :  { %3251 = vmatpush1.bf16.msra.mxu1 %v3783_v60  ;;  %3279 = vmatpush3.bf16.msra.mxu0 %v3745_v31 }
 0x587   :  { %3253 = vmatprep.subr.bf16.mxu1 %v3787_v61  ;;  %3281 = vmatprep.subr.bf16.mxu0 %v3766_v48 }
 0x58a   :  { %3255 = vmatpush1.bf16.msra.mxu1 %v3796_v6  ;;  %3283 = vmatpush3.bf16.msra.mxu0 %v3766_v48 }
 0x58b   :  { %3257 = vmatprep.subr.bf16.mxu1 %v3800_v7  ;;  %3285 = vmatprep.subr.bf16.mxu0 %v3790_v4 }
 0x58e   :  { %3259 = vmatpush1.bf16.msra.mxu1 %v3807_v20  ;;  %3287 = vmatpush3.bf16.msra.mxu0 %v3790_v4 }
 0x58f   :  { %3261 = vmatprep.subr.bf16.mxu1 %v3811_v21  ;;  %3289 = vmatprep.subr.bf16.mxu0 %v3814_v29 }
 0x592   :  { %3263 = vmatpush1.bf16.msra.mxu1 %v3820_v30  ;;  %3291 = vmatpush3.bf16.msra.mxu0 %v3814_v29 }
 0x593   :  { %3265 = vmatprep.subr.bf16.mxu1 %v3824_v32  ;;  %3293 = vmatprep.subr.bf16.mxu0 %v3837_v40 }
 0x596   :  { %3267 = vmatpush1.bf16.msra.mxu1 %v3832_v39  ;;  %3295 = vmatpush3.bf16.msra.mxu0 %v3837_v40 }
 0x597   :  { %3297 = vmatprep.subr.bf16.mxu0 %v3847_v11  ;;  %3301 = vmatprep.subr.bf16.mxu1 %v4837_v41 }
 0x59a   :  { %3299 = vmatpush3.bf16.msra.mxu0 %v3847_v11 }
 0x59b   :  { %3333 = vmatprep.subr.bf16.mxu0 %v3726_v19 }
 0x64c   :  { %v1749_v22 = vpop.f32.mrb[42].mxu1 }
 0x64d   :  { %v1835_v49 = vadd.f32 %v1749_v22, %v4874_v16  ;;  %v1751_v8 = vpop.f32.mrb[43].mxu1 }
 0x64e   :  { %v1849_v13 = vadd.f32 %v1751_v8, %v4875_v54 }
 0x64f   :  { %v2362_v18 = vmul.f32 -1.442695, %v1835_v49  ;;  %v4878_v49 = vsel %vm4029_vm3, %v4064_v47, %v4014_v28 }
 0x650   :  { %v1755_v5 = vpop.f32.mrb[44].mxu1  ;;  %v2773_v44 = vpop.f32.mrb[36].mxu0  ;;  %v2364_v58 = vmul.f32 -1.442695, %v1849_v13 }
 0x651   :  { %3475 = vpow2.f32 %v2362_v18  ;;  %v1836_v41 = vadd.f32 %v1755_v5, %v4876_v35  ;;  %v1757_v36 = vpop.f32.mrb[45].mxu1  ;;  %v1826_v55 = vpop.f32.mrb[37].mxu0  ;;  %v1864_v16 = vadd.f32 %v2773_v44, %v4254_v23  ;;  %v4879_v18 = vsel %vm4029_vm3, %v4850_v63, %v4008_v59 }
 0x652   :  { %v1850_v9 = vadd.f32 %v1757_v36, %v4877_v45  ;;  %v1863_v3 = vadd.f32 %v4254_v23, %v1826_v55 }
 0x653   :  { %v2363_v56 = vmul.f32 -1.442695, %v1836_v41 }
 0x654   :  { %v2365_v1 = vmul.f32 -1.442695, %v1850_v9 }
 0x655   :  { %3477 = vpow2.f32 %v2363_v56 }
 0x656   :  { %3479 = vpow2.f32 %v2364_v58 }
 0x657   :  { %3481 = vpow2.f32 %v2365_v1 }
 0x65b   :  { %v3476_v38 = vpop.eup %3475 }
 0x65c   :  { %v1843_v57 = vadd.f32 1.0, %v3476_v38 }
 0x65e   :  { %3483 = vrcp.f32 %v1843_v57 }
 0x65f   :  { %v3478_v17 = vpop.eup %3477 }
 0x660   :  { %v1844_v37 = vadd.f32 1.0, %v3478_v17  ;;  %v3480_v46 = vpop.eup %3479 }
 0x661   :  { %v3482_v62 = vpop.eup %3481  ;;  %v1857_v0 = vadd.f32 1.0, %v3480_v46 }
 0x662   :  { %3485 = vrcp.f32 %v1844_v37  ;;  %v1858_v26 = vadd.f32 1.0, %v3482_v62 }
 0x663   :  { %3487 = vrcp.f32 %v1857_v0 }
 0x664   :  { %3489 = vrcp.f32 %v1858_v26 }
 0x668   :  { %v3484_v22 = vpop.eup %3483 }
 0x669   :  { %v1865_v53 = vmul.f32 %v3484_v22, %v1863_v3  ;;  %v4887_v3 = vld [vmem:[#allocation38_spill] sm:$0xff] }
 0x66a   :  { %v4888_v22 = vld [vmem:[#allocation26_spill] sm:$0xff] }
 0x66b   :  { %v1867_v8 = vadd.f32 %v1865_v53, %v4878_v49  ;;  %v4889_v26 = vsel %vm4029_vm3, %v4887_v3, %v4888_v22  ;;  %v4901_v3 = vld [vmem:[#allocation45_spill] sm:$0xff]  ;;  %v4902_v22 = vld [vmem:[#allocation44_spill] sm:$0xff] }
 0x66c   :  { %v3486_v54 = vpop.eup %3485 }
 0x66d   :  { %v1866_v13 = vmul.f32 %v3486_v54, %v1864_v16  ;;  %3491 = vtanh.f32 %v1867_v8  ;;  %v3488_v35 = vpop.eup %3487  ;;  %v4890_v8 = vld [vmem:[#allocation37_spill] sm:$0xff] }
 0x66e   :  { %v3490_v41 = vpop.eup %3489  ;;  %v1871_v23 = vsub.f32 1.0, %v3488_v35  ;;  %v1875_v55 = vmul.f32 %v3488_v35, %v4534_v25  ;;  %v4891_v54 = vld [vmem:[#allocation25_spill] sm:$0xff] }
 0x66f   :  { %v1868_v5 = vadd.f32 %v1866_v13, %v4879_v18  ;;  %v1872_v47 = vsub.f32 1.0, %v3490_v41  ;;  %v1876_v59 = vmul.f32 %v3490_v41, %v4541_v52  ;;  %v4892_v13 = vsel %vm4029_vm3, %v4890_v8, %v4891_v54  ;;  %v4904_v8 = vld [vmem:[#allocation43_spill] sm:$0xff]  ;;  %v4905_v54 = vld [vmem:[#allocation42_spill] sm:$0xff] }
 0x671   :  { %3493 = vtanh.f32 %v1868_v5 }
 0x677   :  { %v3492_v44 = vpop.eup %3491 }
 0x678   :  { %v1873_v36 = vmul.f32 %v3492_v44, %v1871_v23 }
 0x67a   :  { %v4602_v28 = vadd.f32 %v1875_v55, %v1873_v36 }
 0x67b   :  { %v3494_v45 = vpop.eup %3493 }
 0x67c   :  { %1952 = vmatmul.mubr.f32.vlgmr.msra.gmra.mrb[46].mxu1 %v4602_v28  ;;  %2806 = vmatprep.mubr.f32.mxu0 %v4602_v28  ;;  %v1874_v9 = vmul.f32 %v3494_v45, %v1872_v47 }
 0x67d   :  { %1957 = vmatprep.mubr.f32.mxu1 %v4835_v14  ;;  %3303 = vmatpush1.bf16.msra.mxu1 %v3749_v33 }
 0x67e   :  { %v4609_v63 = vadd.f32 %v1876_v59, %v1874_v9  ;;  %3305 = vmatprep.subr.bf16.mxu1 %v3751_v34  ;;  %v4881_v34 = vld [vmem:[#allocation48_spill] sm:$0xff] }
 0x680   :  { %1958 = vmatmul.mubr.f32.gmra.mrb[48].mxu1 %v4609_v63  ;;  %2807 = vmatmul.mubr.f32.vlgmr.msra.gmra.mrb[38].mxu0 %v4609_v63 }
 0x681   :  { %3307 = vmatpush1.bf16.msra.mxu1 %v3759_v42  ;;  %3335 = vmatpush3.bf16.msra.mxu0 %v3726_v19  ;;  %v4882_v42 = vld [vmem:[#allocation20_spill] sm:$0xff] }
 0x682   :  { %3309 = vmatprep.subr.bf16.mxu1 %v3763_v43  ;;  %3337 = vmatprep.subr.bf16.mxu0 %v3738_v24  ;;  %v4883_v43 = vsel %vm3915_vm2, %v4881_v34, %v4882_v42  ;;  %v4894_v42 = vld [vmem:[#allocation16_spill] sm:$0xff] }
 0x683   :  { %2155 = vmatprep.mubr.f32.mxu1 %v4835_v14 }
 0x685   :  { %3311 = vmatpush1.bf16.msra.mxu1 %v3772_v50  ;;  %3339 = vmatpush3.bf16.msra.mxu0 %v3738_v24  ;;  %v4880_v24 = vld [vmem:[#allocation49_spill] sm:$0xff] }
 0x686   :  { %3313 = vmatprep.subr.bf16.mxu1 %v3776_v51  ;;  %3341 = vmatprep.subr.bf16.mxu0 %v3745_v31 }
 0x689   :  { %3315 = vmatpush1.bf16.msra.mxu1 %v3783_v60  ;;  %3343 = vmatpush3.bf16.msra.mxu0 %v3745_v31 }
 0x68a   :  { %3317 = vmatprep.subr.bf16.mxu1 %v3787_v61  ;;  %3345 = vmatprep.subr.bf16.mxu0 %v3766_v48  ;;  %v4884_v61 = vld [vmem:[#allocation24_spill] sm:$0xff] }
 0x68d   :  { %3319 = vmatpush1.bf16.msra.mxu1 %v3796_v6  ;;  %3347 = vmatpush3.bf16.msra.mxu0 %v3766_v48 }
 0x68e   :  { %3321 = vmatprep.subr.bf16.mxu1 %v3800_v7  ;;  %3349 = vmatprep.subr.bf16.mxu0 %v3790_v4 }
 0x691   :  { %3323 = vmatpush1.bf16.msra.mxu1 %v3807_v20  ;;  %3351 = vmatpush3.bf16.msra.mxu0 %v3790_v4  ;;  %v4885_v20 = vld [vmem:[#allocation22_spill] sm:$0xff] }
 0x692   :  { %3325 = vmatprep.subr.bf16.mxu1 %v3811_v21  ;;  %3353 = vmatprep.subr.bf16.mxu0 %v3814_v29  ;;  %v4886_v21 = vsel %vm3915_vm2, %v4841_v27, %v4885_v20  ;;  %v4658_v27 = vld [vmem:[%s4742_s4] ss:$0 sm:$0xff]  ;;  %v4898_v20 = vld [vmem:[#allocation19_spill] sm:$0xff]  ;;  %s3638_s4 = smov [#allocation9]  }
 0x693   :  { %s2296_s10 = sshll.u32 %s3638_s4, 4  ;;  %s2297_s10 = int_to_ptr.vmem [resolvable:$true] %s2296_s10 }
 0x694   :  { %s3602_s11 = scalar_lea.vmem %s2297_s10, 256  ;;  %p3607_p11 = scmp.lt.s32.totalorder %s2297_s10, %s2297_s10 }
 0x695   :  { %3327 = vmatpush1.bf16.msra.mxu1 %v3820_v30  ;;  %3355 = vmatpush3.bf16.msra.mxu0 %v3814_v29  ;;  %p3603_p10 = scmp.ne.s32.totalorder %s2297_s10, %s3602_s11  ;;  %p3608_p12 = scmp.lt.s32.totalorder %s3602_s11, %s3602_s11 }
 0x696   :  { %3329 = vmatprep.subr.bf16.mxu1 %v3824_v32  ;;  %3357 = vmatprep.subr.bf16.mxu0 %v3837_v40 }
 0x697   :  { %p3609_p13 = por %p3608_p12, %p3607_p11 }
 0x699   :  { %3331 = vmatpush1.bf16.msra.mxu1 %v3832_v39  ;;  %3359 = vmatpush3.bf16.msra.mxu0 %v3837_v40  ;;  %p3610_p0 = pnand %p3609_p13, %p3603_p10 }
 0x69a   :  { %3361 = vmatprep.subr.bf16.mxu0 %v3847_v11 }
 0x69d   :  { %3363 = vmatpush3.bf16.msra.mxu0 %v3847_v11 }
 0x74f   :  { %v1953_v19 = vpop.f32.mrb[46].mxu1 }
 0x750   :  { %v2039_v31 = vadd.f32 %v1953_v19, %v4880_v24  ;;  %v1955_v33 = vpop.f32.mrb[47].mxu1 }
 0x751   :  { %v2053_v48 = vadd.f32 %v1955_v33, %v4883_v43  ;;  %v4895_v43 = vld [vmem:[#allocation15_spill] sm:$0xff] }
 0x752   :  { %v2366_v50 = vmul.f32 -1.442695, %v2039_v31  ;;  %v4893_v31 = vld [vmem:[#allocation17_spill] sm:$0xff] }
 0x753   :  { %v1959_v51 = vpop.f32.mrb[48].mxu1  ;;  %v2808_v60 = vpop.f32.mrb[38].mxu0  ;;  %v2368_v32 = vmul.f32 -1.442695, %v2053_v48  ;;  %v4896_v48 = vsel %vm3915_vm2, %v4894_v42, %v4895_v43 }
 0x754   :  { %3495 = vpow2.f32 %v2366_v50  ;;  %v2040_v4 = vadd.f32 %v1959_v51, %v4884_v61  ;;  %v1961_v6 = vpop.f32.mrb[49].mxu1  ;;  %v2030_v7 = vpop.f32.mrb[39].mxu0  ;;  %v2068_v0 = vadd.f32 %v4658_v27, %v2808_v60 }
 0x755   :  { %v2054_v29 = vadd.f32 %v1961_v6, %v4886_v21  ;;  %v2067_v17 = vadd.f32 %v4658_v27, %v2030_v7  ;;  %v4899_v21 = vld [vmem:[#allocation18_spill] sm:$0xff] }
 0x756   :  { %v2367_v30 = vmul.f32 -1.442695, %v2040_v4 }
 0x757   :  { %v2369_v39 = vmul.f32 -1.442695, %v2054_v29  ;;  %v4900_v29 = vsel %vm3915_vm2, %v4898_v20, %v4899_v21 }
 0x758   :  { %3497 = vpow2.f32 %v2367_v30 }
 0x759   :  { %3499 = vpow2.f32 %v2368_v32 }
 0x75a   :  { %3501 = vpow2.f32 %v2369_v39 }
 0x75e   :  { %v3496_v40 = vpop.eup %3495 }
 0x75f   :  { %v2047_v11 = vadd.f32 1.0, %v3496_v40 }
 0x761   :  { %3503 = vrcp.f32 %v2047_v11 }
 0x762   :  { %v3498_v56 = vpop.eup %3497 }
 0x763   :  { %v2048_v58 = vadd.f32 1.0, %v3498_v56  ;;  %v3500_v1 = vpop.eup %3499 }
 0x764   :  { %v3502_v38 = vpop.eup %3501  ;;  %v2061_v57 = vadd.f32 1.0, %v3500_v1 }
 0x765   :  { %3505 = vrcp.f32 %v2048_v58  ;;  %v2062_v46 = vadd.f32 1.0, %v3502_v38 }
 0x766   :  { %3507 = vrcp.f32 %v2061_v57 }
 0x767   :  { %3509 = vrcp.f32 %v2062_v46 }
 0x76b   :  { %v3504_v37 = vpop.eup %3503 }
 0x76c   :  { %v2069_v62 = vmul.f32 %v3504_v37, %v2067_v17 }
 0x76e   :  { %v2071_v53 = vadd.f32 %v2069_v62, %v4889_v26  ;;  %v4903_v26 = vsel %vm4029_vm3, %v4901_v3, %v4902_v22 }
 0x76f   :  { %v3506_v16 = vpop.eup %3505 }
 0x770   :  { %v2070_v49 = vmul.f32 %v3506_v16, %v2068_v0  ;;  %3511 = vtanh.f32 %v2071_v53  ;;  %v3508_v5 = vpop.eup %3507 }
 0x771   :  { %v3510_v35 = vpop.eup %3509  ;;  %v2075_v41 = vsub.f32 1.0, %v3508_v5  ;;  %v2079_v36 = vmul.f32 %v3508_v5, %v4602_v28  ;;  %v4907_v5 = vld [vmem:[#allocation50_spill] sm:$0xff] }
 0x772   :  { %v2072_v18 = vadd.f32 %v2070_v49, %v4892_v13  ;;  %v2076_v47 = vsub.f32 1.0, %v3510_v35  ;;  %v2080_v59 = vmul.f32 %v3510_v35, %v4609_v63  ;;  %v4906_v13 = vsel %vm4029_vm3, %v4904_v8, %v4905_v54  ;;  %v4908_v35 = vld [vmem:[#allocation13_spill] sm:$0xff] }
 0x774   :  { %3513 = vtanh.f32 %v2072_v18 }
 0x77a   :  { %v3512_v23 = vpop.eup %3511 }
 0x77b   :  { %v2077_v44 = vmul.f32 %v3512_v23, %v2075_v41  ;;  %v1035_v41 = vadd.f32 %v4908_v35, %v4907_v5 }
 0x77d   :  { %v4673_v55 = vadd.f32 %v2079_v36, %v2077_v44  ;;  %v4910_v36 = vld [vmem:[#allocation51_spill] sm:$0xff] }
 0x77e   :  { %v3514_v45 = vpop.eup %3513 }
 0x77f   :  { %2156 = vmatmul.mubr.f32.vlgmr.msra.gmra.mrb[50].mxu1 %v4673_v55  ;;  %2841 = vmatprep.mubr.f32.mxu0 %v4673_v55  ;;  %v2078_v9 = vmul.f32 %v3514_v45, %v2076_v47  ;;  %v4911_v47 = vld [vmem:[#allocation23_spill] sm:$0xff] }
 0x780   :  { %2161 = vmatprep.mubr.f32.mxu1 %v4835_v14  ;;  %v4897_v14 = vld [vmem:[#allocation21_spill] sm:$0xff]  ;;  %v1036_v45 = vadd.f32 %v4911_v47, %v4910_v36 }
 0x781   :  { %v4679_v19 = vadd.f32 %v2080_v59, %v2078_v9 }
 0x783   :  { %2162 = vmatmul.mubr.f32.gmra.mrb[52].mxu1 %v4679_v19  ;;  %2842 = vmatmul.mubr.f32.vlgmr.msra.gmra.mrb[40].mxu0 %v4679_v19 }
 0x852   :  { %v2157_v24 = vpop.f32.mrb[50].mxu1 }
 0x853   :  { %v2243_v33 = vadd.f32 %v2157_v24, %v4893_v31  ;;  %v2159_v34 = vpop.f32.mrb[51].mxu1  ;;  %v4912_v24 = vld [vmem:[#allocation33_spill] sm:$0xff] }
 0x854   :  { %v2257_v50 = vadd.f32 %v2159_v34, %v4896_v48  ;;  %v1254_v31 = vadd.f32 %v4912_v24, %v1036_v45 }
 0x855   :  { %v2370_v51 = vmul.f32 -1.442695, %v2243_v33 }
 0x856   :  { %v2163_v60 = vpop.f32.mrb[52].mxu1  ;;  %v2843_v61 = vpop.f32.mrb[40].mxu0  ;;  %v2372_v39 = vmul.f32 -1.442695, %v2257_v50  ;;  %v1472_v42 = vadd.f32 %v4473_v15, %v1254_v31 }
 0x857   :  { %3515 = vpow2.f32 %v2370_v51  ;;  %v2244_v4 = vadd.f32 %v2163_v60, %v4897_v14  ;;  %v2165_v6 = vpop.f32.mrb[53].mxu1  ;;  %v2234_v7 = vpop.f32.mrb[41].mxu0  ;;  %v2272_v0 = vadd.f32 %v4658_v27, %v2843_v61 }
 0x858   :  { %v2258_v30 = vadd.f32 %v2165_v6, %v4900_v29  ;;  %v2271_v12 = vadd.f32 %v4658_v27, %v2234_v7  ;;  %v4909_v27 = vld [vmem:[#allocation14_spill] sm:$0xff]  ;;  %v1676_v51 = vadd.f32 %v4541_v52, %v1472_v42 }
 0x859   :  { %v2371_v32 = vmul.f32 -1.442695, %v2244_v4  ;;  %v1253_v23 = vadd.f32 %v4909_v27, %v1035_v41 }
 0x85a   :  { %v2373_v40 = vmul.f32 -1.442695, %v2258_v30  ;;  %v1880_v4 = vadd.f32 %v4609_v63, %v1676_v51 }
 0x85b   :  { %3517 = vpow2.f32 %v2371_v32  ;;  %v1471_v9 = vadd.f32 %v4466_v2, %v1253_v23 }
 0x85c   :  { %3519 = vpow2.f32 %v2372_v39  ;;  %v2084_v15 = vadd.f32 %v4679_v19, %v1880_v4 }
 0x85d   :  { %3521 = vpow2.f32 %v2373_v40  ;;  %v1675_v10 = vadd.f32 %v4534_v25, %v1471_v9 }
 0x85f   :  { %v1879_v43 = vadd.f32 %v4602_v28, %v1675_v10 }
 0x861   :  { %v3516_v11 = vpop.eup %3515  ;;  %v2083_v60 = vadd.f32 %v4673_v55, %v1879_v43 }
 0x862   :  { %v2251_v56 = vadd.f32 1.0, %v3516_v11 }
 0x864   :  { %3523 = vrcp.f32 %v2251_v56 }
 0x865   :  { %v3518_v58 = vpop.eup %3517 }
 0x866   :  { %v2252_v1 = vadd.f32 1.0, %v3518_v58  ;;  %v3520_v38 = vpop.eup %3519 }
 0x867   :  { %v3522_v57 = vpop.eup %3521  ;;  %v2265_v17 = vadd.f32 1.0, %v3520_v38 }
 0x868   :  { %3525 = vrcp.f32 %v2252_v1  ;;  %v2266_v46 = vadd.f32 1.0, %v3522_v57 }
 0x869   :  { %3527 = vrcp.f32 %v2265_v17 }
 0x86a   :  { %3529 = vrcp.f32 %v2266_v46 }
 0x86e   :  { %v3524_v37 = vpop.eup %3523 }
 0x86f   :  { %v2273_v62 = vmul.f32 %v3524_v37, %v2271_v12 }
 0x871   :  { %v2275_v53 = vadd.f32 %v2273_v62, %v4903_v26 }
 0x872   :  { %v3526_v16 = vpop.eup %3525 }
 0x873   :  { %v2274_v49 = vmul.f32 %v3526_v16, %v2272_v0  ;;  %3531 = vtanh.f32 %v2275_v53  ;;  %v3528_v44 = vpop.eup %3527 }
 0x874   :  { %v3530_v59 = vpop.eup %3529  ;;  %v2279_v33 = vsub.f32 1.0, %v3528_v44  ;;  %v2283_v50 = vmul.f32 %v3528_v44, %v4673_v55 }
 0x875   :  { %v2276_v18 = vadd.f32 %v2274_v49, %v4906_v13  ;;  %v2280_v61 = vsub.f32 1.0, %v3530_v59  ;;  %v2284_v25 = vmul.f32 %v3530_v59, %v4679_v19 }
 0x877   :  { %3533 = vtanh.f32 %v2276_v18 }
 0x87d   :  { %v3532_v34 = vpop.eup %3531 }
 0x87e   :  { %v2281_v48 = vmul.f32 %v3532_v34, %v2279_v33 }
 0x880   :  { %v2285_v2 = vadd.f32 %v2283_v50, %v2281_v48 }
 0x881   :  { %v3534_v14 = vpop.eup %3533 }
 0x882   :  { %v2282_v6 = vmul.f32 %v3534_v14, %v2280_v61  ;;  %v2287_v7 = vadd.f32 %v2285_v2, %v2083_v60 }
 0x884   :  { %v2286_v28 = vadd.f32 %v2284_v25, %v2282_v6  ;;  %2289 = vst [vmem:[#allocation9] sm:$0xff] %v2287_v7 }
 0x886   :  { %v2288_v20 = vadd.f32 %v2286_v28, %v2084_v15 }
 0x888   :  { %2290 = vst [vmem:[#allocation9 + $0x8] sm:$0xff] %v2288_v20 }
 0x889   :  { %3613 = shalt.err (!%p3610_p0)
}
 0x88a   :  { %s3614_s14 = scalar_lea.hbm %s4743_s5, 256 }
 0x88b   :  { %p3615_p1 = scmp.ne.s32.totalorder %s4743_s5, %s3614_s14  ;;  %p3618_p2 = scmp.lt.u32.totalorder %s3614_s14, %s4743_s5 }
 0x88d   :  { %p3620_p3 = pnand %p3618_p2, %p3615_p1 }
 0x88f   :  { %3623 = shalt.err (!%p3620_p3)
}
 0x890   :  { %2302 = dma.vmem_to_hbm [thread:$0]  %s2297_s10, 256, %s4743_s5, [#allocation5], %s3634_s1, %s3634_s1, %s3635_s17  }
 0x891   :  { %3628 = dma.done.wait [#allocation5], 256  }
 0x892   :  { %3629 = vsyncadd [#allocation5], 4294967040 }
 0x893   :  { %2306 = vsyncpa [#allocation4], 1 }
 0x894   :  { %2307 = vsyncpa [#allocation7], 1 }
 0x895   :  { %2308 = vsyncpa [#allocation5], 1 }

</bundles_post_ra>
